<compile_context>
chip_gen: v7x
topology: tpu7x:2x2x1
jax: 0.10.0
libtpu: 0.0.40
codegen_flags: <defaults>
</compile_context>

<pallas_src>
import math

import jax
import jax.numpy as jnp
from jax.experimental import pallas as pl
from jax.experimental.pallas import tpu as pltpu

_LANE = 128


def _pad_lanes(n):
    return ((n + _LANE - 1) // _LANE) * _LANE


def _vmem_bytes(rows, c, act_itemsize, ctx_itemsize):
    """Lane-padding-aware per-step VMEM footprint estimate (fixes the v2
    heuristic that under-counted padding ~4x and ignored f32 intermediates)."""
    x_slab = rows * _pad_lanes(3 * c) * act_itemsize * 2      # input, double buffered
    o_slab = rows * _pad_lanes(c) * 4 * 2                     # f32 output, double buffered
    qkv_f32 = rows * _pad_lanes(3 * c) * 4 * 2                # f32 qkv + compiler temps
    ctx = rows * _pad_lanes(c) * ctx_itemsize                 # ctx scratch
    w = (3 * c * _pad_lanes(3 * c) + c * _pad_lanes(c) + 8 * _pad_lanes(c)) \
        * act_itemsize * 2
    return x_slab + o_slab + qkv_f32 + ctx + w


def _pick_group_size(bn, t, c, act_itemsize, ctx_itemsize, sub_mult, budget):
    """Largest divisor g of bn such that: rows=g*t <= 1024, rows respects the
    sublane tile of the activation dtype, the padded VMEM footprint fits the
    budget, and (preferred) the grid keeps >= 2 steps for v7x's two TCs."""
    divisors = [g for g in range(1, bn + 1) if bn % g == 0]
    for need_two_steps in (True, False):
        cands = []
        for g in divisors:
            rows = g * t
            if rows > 1024:
                continue
            if rows % sub_mult != 0 and g != bn:
                continue
            if need_two_steps and bn >= 2 and bn // g < 2:
                continue
            if _vmem_bytes(rows, c, act_itemsize, ctx_itemsize) > budget:
                continue
            cands.append(g)
        if cands:
            return max(cands)
    return bn  # full-array fallback (always shape-legal)


def _make_kernel(heads, head_dim, group, seq, embed, compute_dtype):
    inv_sqrt_dk = 1.0 / math.sqrt(head_dim)
    rows = group * seq
    use_lp = compute_dtype is not None
    cast = (lambda a: a.astype(compute_dtype)) if use_lp else (lambda a: a)

    def kernel(x_ref, w3_ref, wo_ref, bo_ref, out_ref, ctx_ref):
        # Fused block-diagonal QKV projection: one (rows, 3C) @ (3C, 3C) MXU
        # pass producing [q | k | v], f32 accumulation.
        qkv = jnp.dot(x_ref[...], w3_ref[...], preferred_element_type=jnp.float32)

        # Per-head attention, batched over the `group` complete (b, n) slabs.
        # TODO(synk): a single (G*H)-batched einsum would need a (G,T,H,dk)
        # sublane<->lane transpose (dk=8); kept as a static head loop.
        for h in range(heads):
            lo = h * head_dim
            hi = lo + head_dim
            qh = cast(qkv[:, lo:hi]).reshape(group, seq, head_dim)
            kh = cast(qkv[:, embed + lo:embed + hi]).reshape(group, seq, head_dim)
            vh = cast(qkv[:, 2 * embed + lo:2 * embed + hi]).reshape(
                group, seq, head_dim)

            # scores: contract head_dim of both operands (no K transpose).
            s = jnp.einsum('gtd,gsd->gts', qh, kh,
                           preferred_element_type=jnp.float32) * inv_sqrt_dk
            s = s - jnp.max(s, axis=-1, keepdims=True)        # stable softmax (f32)
            p = jnp.exp(s)
            denom = jnp.sum(p, axis=-1, keepdims=True)
            if use_lp:
                attn = p * pl.reciprocal(denom, approx=True)  # EUP vrcp slot
            else:
                attn = p / denom                              # exact on f32 path

            ctx = jnp.einsum('gts,gsd->gtd', cast(attn), vh,
                             preferred_element_type=jnp.float32)
            # Reassemble per-head context into one (rows, C) buffer so fc_out
            # is a single K=C matmul (undo v2's per-head decomposition).
            ctx_ref[:, lo:hi] = ctx.reshape(rows, head_dim).astype(ctx_ref.dtype)

        out = jnp.dot(ctx_ref[...], wo_ref[...],
                      preferred_element_type=jnp.float32)
        out = out + bo_ref[...].astype(jnp.float32)
        out_ref[...] = out.astype(out_ref.dtype)

    return kernel


def tmha_pallas(input_q, input_k, input_v, w_q, w_k, w_v, w_o, b_o, *,
                heads, compute_dtype=jnp.bfloat16, group_size=None):
    """Forward pass of TMultiHeadAttention.

    input_*: [B, N, T, C]; w_*: [C, C] (PyTorch Linear layout [out, in]);
    b_o: [C].  compute_dtype=jnp.bfloat16 (default) feeds the MXU bf16
    operands with f32 accumulation and f32 softmax math; compute_dtype=None
    keeps everything f32 (bit-tight against the reference)."""
    B, N, T, C = input_q.shape
    head_dim = C // heads
    assert head_dim * heads == C, "embed_size must be divisible by heads"

    BN = B * N
    total_rows = BN * T
    out_dtype = input_q.dtype

    act_dtype = jnp.dtype(compute_dtype) if compute_dtype is not None \
        else jnp.dtype(input_q.dtype)
    ctx_dtype = act_dtype if compute_dtype is not None else jnp.dtype(jnp.float32)
    act_itemsize = act_dtype.itemsize
    ctx_itemsize = ctx_dtype.itemsize

    # Fused activation slab: [xq | xk | xv] along C -> 3C = lane-dense columns.
    xq = input_q.reshape(total_rows, C)
    xk = input_k.reshape(total_rows, C)
    xv = input_v.reshape(total_rows, C)
    x_cat = jnp.concatenate([xq, xk, xv], axis=-1).astype(act_dtype)

    # Block-diagonal fused QKV weight, pre-transposed (kernel does x @ W).
    w3 = jnp.zeros((3 * C, 3 * C), act_dtype)
    w3 = w3.at[0:C, 0:C].set(w_q.T.astype(act_dtype))
    w3 = w3.at[C:2 * C, C:2 * C].set(w_k.T.astype(act_dtype))
    w3 = w3.at[2 * C:, 2 * C:].set(w_v.T.astype(act_dtype))
    woT = w_o.T.astype(act_dtype)
    bo2 = b_o.reshape(1, C).astype(jnp.float32)   # bias added in f32

    # Generation-aware VMEM budgeting (v7x has 64 MiB vs 128 MiB on v5e/v6e).
    try:
        vmem_cap = int(pltpu.get_tpu_info().vmem_capacity_bytes)
    except Exception:
        vmem_cap = 64 * 1024 * 1024
    budget = min(vmem_cap // 4, 24 * 1024 * 1024)

    sub_mult = 16 if act_itemsize == 2 else 8     # bf16 needs 16-row sublane tiles
    G = group_size if group_size is not None else _pick_group_size(
        BN, T, C, act_itemsize, ctx_itemsize, sub_mult, budget)
    assert BN % G == 0
    rows = G * T

    est = _vmem_bytes(rows, C, act_itemsize, ctx_itemsize)
    vmem_limit = int(min(max(2 * est, 16 * 1024 * 1024), vmem_cap * 3 // 4))

    x_spec = pl.BlockSpec((rows, 3 * C), lambda i: (i, 0))
    w3_spec = pl.BlockSpec((3 * C, 3 * C), lambda i: (0, 0))   # constant: VMEM-resident
    wo_spec = pl.BlockSpec((C, C), lambda i: (0, 0))
    b_spec = pl.BlockSpec((1, C), lambda i: (0, 0))
    out_spec = pl.BlockSpec((rows, C), lambda i: (i, 0))

    flops = int(2 * total_rows * (3 * C) * (3 * C)
                + 2 * 2 * BN * heads * T * T * head_dim
                + 2 * total_rows * C * C)
    transcendentals = int(BN * heads * T * T)
    bytes_accessed = int(x_cat.size * act_itemsize + w3.size * act_itemsize
                         + woT.size * act_itemsize + bo2.size * 4
                         + total_rows * C * jnp.dtype(out_dtype).itemsize)

    out = pl.pallas_call(
        _make_kernel(heads, head_dim, G, T, C, compute_dtype),
        out_shape=jax.ShapeDtypeStruct((total_rows, C), out_dtype),
        grid_spec=pltpu.PrefetchScalarGridSpec(
            num_scalar_prefetch=0,
            grid=(BN // G,),
            in_specs=[x_spec, w3_spec, wo_spec, b_spec],
            out_specs=out_spec,
            scratch_shapes=[pltpu.VMEM((rows, C), ctx_dtype)]),
        compiler_params=pltpu.CompilerParams(
            dimension_semantics=("parallel",),
            vmem_limit_bytes=vmem_limit),
        cost_estimate=pl.CostEstimate(
            flops=flops, transcendentals=transcendentals,
            bytes_accessed=bytes_accessed),
    )(x_cat, w3, woT, bo2)

    return out.reshape(B, N, T, C)


def tmha_reference(input_q, input_k, input_v, w_q, w_k, w_v, w_o, b_o, *, heads):
    """Pure-JAX reference mirroring the PyTorch forward exactly (f32)."""
    B, N, T, C = input_q.shape
    dk = C // heads

    def proj(x, w):  # nn.Linear(bias=False): x @ W^T
        y = jnp.einsum('bntc,oc->bnto', x, w)
        return y.reshape(B, N, T, heads, dk).transpose(0, 3, 1, 2, 4)

    Q, K, V = proj(input_q, w_q), proj(input_k, w_k), proj(input_v, w_v)
    scores = jnp.einsum('bhntd,bhnsd->bhnts', Q, K) / math.sqrt(dk)
    attn = jax.nn.softmax(scores, axis=-1)
    ctx = jnp.einsum('bhnts,bhnsd->bhntd', attn, V)
    ctx = ctx.transpose(0, 2, 3, 1, 4).reshape(B, N, T, heads * dk)
    return jnp.einsum('bntc,oc->bnto', ctx, w_o) + b_o


if __name__ == "__main__":
    B, N, T, C = 2, 4, 8, 32
    heads = 4

    key = jax.random.PRNGKey(0)
    k1, k2, k3, k4, k5, k6, k7, k8 = jax.random.split(key, 8)

    input_q = jax.random.normal(k1, (B, N, T, C), dtype=jnp.float32)
    input_k = jax.random.normal(k2, (B, N, T, C), dtype=jnp.float32)
    input_v = jax.random.normal(k3, (B, N, T, C), dtype=jnp.float32)

    # nn.Linear weights are [out_features, in_features]; deterministic init.
    scale = 1.0 / math.sqrt(C)
    w_q = jax.random.uniform(k4, (C, C), jnp.float32, -scale, scale)
    w_k = jax.random.uniform(k5, (C, C), jnp.float32, -scale, scale)
    w_v = jax.random.uniform(k6, (C, C), jnp.float32, -scale, scale)
    w_o = jax.random.uniform(k7, (C, C), jnp.float32, -scale, scale)
    b_o = jax.random.uniform(k8, (C,), jnp.float32, -scale, scale)

    ref = tmha_reference(input_q, input_k, input_v, w_q, w_k, w_v, w_o, b_o,
                         heads=heads)

    # 1) f32 path (compute_dtype=None): exact softmax divide, tight tolerance.
    out_f32 = tmha_pallas(input_q, input_k, input_v, w_q, w_k, w_v, w_o, b_o,
                          heads=heads, compute_dtype=None)
    out_f32 = jax.block_until_ready(out_f32)
    assert out_f32.shape == (B, N, T, C)
    err_f32 = float(jnp.max(jnp.abs(out_f32 - ref)))
    assert jnp.allclose(out_f32, ref, atol=1e-3, rtol=1e-3), \
        f"f32 path mismatch vs reference (max|diff|={err_f32})"

    # 2) default bf16-operand path (f32 accumulation + f32 softmax math):
    #    looser tolerance is expected from bf16 MXU operands + approx vrcp.
    out_bf16 = tmha_pallas(input_q, input_k, input_v, w_q, w_k, w_v, w_o, b_o,
                           heads=heads)
    out_bf16 = jax.block_until_ready(out_bf16)
    err_bf16 = float(jnp.max(jnp.abs(out_bf16 - ref)))
    assert jnp.allclose(out_bf16, ref, atol=5e-2, rtol=5e-2), \
        f"bf16 path mismatch vs reference (max|diff|={err_bf16})"

    print("KERNEL_OK")
</pallas_src>

<mosaic_0001>
module attributes {stable_mosaic.version = 11 : i64} {
  func.func @kernel(%arg0: i32, %arg1: memref<32x96xf32, #tpu.memory_space<vmem>>, %arg2: memref<96x96xf32, #tpu.memory_space<vmem>>, %arg3: memref<32x32xf32, #tpu.memory_space<vmem>>, %arg4: memref<1x32xf32, #tpu.memory_space<vmem>>, %arg5: memref<32x32xf32, #tpu.memory_space<vmem>>, %arg6: memref<32x32xf32, #tpu.memory_space<vmem>>) attributes {dimension_semantics = [#tpu.dimension_semantics<parallel>], iteration_bounds = array<i64: 2>, scalar_prefetch = 0 : i64, scratch_operands = 1 : i64, tpu.core_type = #tpu.core_type<tc>, window_params = [{transform_indices = @transform_0, window_bounds = array<i64: 32, 96>}, {pipeline_mode = #tpu.pipeline_mode<synchronous>, transform_indices = @transform_1, window_bounds = array<i64: 96, 96>}, {pipeline_mode = #tpu.pipeline_mode<synchronous>, transform_indices = @transform_2, window_bounds = array<i64: 32, 32>}, {pipeline_mode = #tpu.pipeline_mode<synchronous>, transform_indices = @transform_3, window_bounds = array<i64: 1, 32>}, {transform_indices = @transform_4, window_bounds = array<i64: 32, 32>}]} {
    %c0 = arith.constant 0 : index
    %c0_0 = arith.constant 0 : index
    %0 = vector.load %arg1[%c0, %c0_0] : memref<32x96xf32, #tpu.memory_space<vmem>>, vector<32x96xf32>
    %c0_1 = arith.constant 0 : index
    %c0_2 = arith.constant 0 : index
    %1 = vector.load %arg2[%c0_1, %c0_2] : memref<96x96xf32, #tpu.memory_space<vmem>>, vector<96x96xf32>
    %cst = arith.constant dense<0.000000e+00> : vector<32x96xf32>
    %2 = tpu.matmul %0, %1, %cst {dimension_numbers = #tpu.dot_dimension_numbers<[1], [0], [0], [1], [0, 0, 1, 1], [], []>} : vector<32x96xf32>, vector<96x96xf32>, vector<32x96xf32> -> vector<32x96xf32>
    %3 = vector.extract_strided_slice %2 {offsets = [0, 0], sizes = [32, 8], strides = [1, 1]} : vector<32x96xf32> to vector<32x8xf32>
    %4 = vector.shape_cast %3 : vector<32x8xf32> to vector<4x8x8xf32>
    %5 = vector.extract_strided_slice %2 {offsets = [0, 32], sizes = [32, 8], strides = [1, 1]} : vector<32x96xf32> to vector<32x8xf32>
    %6 = vector.shape_cast %5 : vector<32x8xf32> to vector<4x8x8xf32>
    %7 = vector.extract_strided_slice %2 {offsets = [0, 64], sizes = [32, 8], strides = [1, 1]} : vector<32x96xf32> to vector<32x8xf32>
    %8 = vector.shape_cast %7 : vector<32x8xf32> to vector<4x8x8xf32>
    "tpu.trace_start"() <{level = 10 : i32, message = "gtd,gsd->gts"}> : () -> ()
    %cst_3 = arith.constant dense<0.000000e+00> : vector<4x8x8xf32>
    %9 = tpu.matmul %4, %6, %cst_3 {dimension_numbers = #tpu.dot_dimension_numbers<[2], [2], [1], [1], [0, 0, 0, 1, 1, 1], [0], [0]>} : vector<4x8x8xf32>, vector<4x8x8xf32>, vector<4x8x8xf32> -> vector<4x8x8xf32>
    "tpu.trace_stop"() : () -> ()
    %cst_4 = arith.constant 0.353553385 : f32
    %10 = vector.broadcast %cst_4 : f32 to vector<4x8x8xf32>
    %11 = arith.mulf %9, %10 : vector<4x8x8xf32>
    %cst_5 = arith.constant dense<0xFF800000> : vector<4x8xf32>
    %12 = vector.multi_reduction <maximumf>, %11, %cst_5 [2] : vector<4x8x8xf32> to vector<4x8xf32>
    %13 = vector.shape_cast %12 : vector<4x8xf32> to vector<4x8x1xf32>
    %14 = vector.broadcast %13 : vector<4x8x1xf32> to vector<4x8x8xf32>
    %15 = arith.subf %11, %14 : vector<4x8x8xf32>
    %16 = math.exp %15 : vector<4x8x8xf32>
    %cst_6 = arith.constant dense<0.000000e+00> : vector<4x8xf32>
    %17 = vector.multi_reduction <add>, %16, %cst_6 [2] : vector<4x8x8xf32> to vector<4x8xf32>
    %18 = vector.shape_cast %17 : vector<4x8xf32> to vector<4x8x1xf32>
    %19 = vector.broadcast %18 : vector<4x8x1xf32> to vector<4x8x8xf32>
    %20 = arith.divf %16, %19 : vector<4x8x8xf32>
    "tpu.trace_start"() <{level = 10 : i32, message = "gts,gsd->gtd"}> : () -> ()
    %cst_7 = arith.constant dense<0.000000e+00> : vector<4x8x8xf32>
    %21 = tpu.matmul %20, %8, %cst_7 {dimension_numbers = #tpu.dot_dimension_numbers<[2], [1], [1], [2], [0, 0, 0, 1, 1, 2], [0], [0]>} : vector<4x8x8xf32>, vector<4x8x8xf32>, vector<4x8x8xf32> -> vector<4x8x8xf32>
    "tpu.trace_stop"() : () -> ()
    %22 = vector.shape_cast %21 : vector<4x8x8xf32> to vector<32x8xf32>
    %c0_8 = arith.constant 0 : index
    %c0_9 = arith.constant 0 : index
    %23 = vector.load %arg6[%c0_8, %c0_9] : memref<32x32xf32, #tpu.memory_space<vmem>>, vector<32x8xf32>
    tpu.vector_store %arg6[%c0_8, %c0_9], %22 {strides = array<i32>} : memref<32x32xf32, #tpu.memory_space<vmem>>, vector<32x8xf32>,
    %24 = vector.extract_strided_slice %2 {offsets = [0, 8], sizes = [32, 8], strides = [1, 1]} : vector<32x96xf32> to vector<32x8xf32>
    %25 = vector.shape_cast %24 : vector<32x8xf32> to vector<4x8x8xf32>
    %26 = vector.extract_strided_slice %2 {offsets = [0, 40], sizes = [32, 8], strides = [1, 1]} : vector<32x96xf32> to vector<32x8xf32>
    %27 = vector.shape_cast %26 : vector<32x8xf32> to vector<4x8x8xf32>
    %28 = vector.extract_strided_slice %2 {offsets = [0, 72], sizes = [32, 8], strides = [1, 1]} : vector<32x96xf32> to vector<32x8xf32>
    %29 = vector.shape_cast %28 : vector<32x8xf32> to vector<4x8x8xf32>
    "tpu.trace_start"() <{level = 10 : i32, message = "gtd,gsd->gts"}> : () -> ()
    %cst_10 = arith.constant dense<0.000000e+00> : vector<4x8x8xf32>
    %30 = tpu.matmul %25, %27, %cst_10 {dimension_numbers = #tpu.dot_dimension_numbers<[2], [2], [1], [1], [0, 0, 0, 1, 1, 1], [0], [0]>} : vector<4x8x8xf32>, vector<4x8x8xf32>, vector<4x8x8xf32> -> vector<4x8x8xf32>
    "tpu.trace_stop"() : () -> ()
    %cst_11 = arith.constant 0.353553385 : f32
    %31 = vector.broadcast %cst_11 : f32 to vector<4x8x8xf32>
    %32 = arith.mulf %30, %31 : vector<4x8x8xf32>
    %cst_12 = arith.constant dense<0xFF800000> : vector<4x8xf32>
    %33 = vector.multi_reduction <maximumf>, %32, %cst_12 [2] : vector<4x8x8xf32> to vector<4x8xf32>
    %34 = vector.shape_cast %33 : vector<4x8xf32> to vector<4x8x1xf32>
    %35 = vector.broadcast %34 : vector<4x8x1xf32> to vector<4x8x8xf32>
    %36 = arith.subf %32, %35 : vector<4x8x8xf32>
    %37 = math.exp %36 : vector<4x8x8xf32>
    %cst_13 = arith.constant dense<0.000000e+00> : vector<4x8xf32>
    %38 = vector.multi_reduction <add>, %37, %cst_13 [2] : vector<4x8x8xf32> to vector<4x8xf32>
    %39 = vector.shape_cast %38 : vector<4x8xf32> to vector<4x8x1xf32>
    %40 = vector.broadcast %39 : vector<4x8x1xf32> to vector<4x8x8xf32>
    %41 = arith.divf %37, %40 : vector<4x8x8xf32>
    "tpu.trace_start"() <{level = 10 : i32, message = "gts,gsd->gtd"}> : () -> ()
    %cst_14 = arith.constant dense<0.000000e+00> : vector<4x8x8xf32>
    %42 = tpu.matmul %41, %29, %cst_14 {dimension_numbers = #tpu.dot_dimension_numbers<[2], [1], [1], [2], [0, 0, 0, 1, 1, 2], [0], [0]>} : vector<4x8x8xf32>, vector<4x8x8xf32>, vector<4x8x8xf32> -> vector<4x8x8xf32>
    "tpu.trace_stop"() : () -> ()
    %43 = vector.shape_cast %42 : vector<4x8x8xf32> to vector<32x8xf32>
    %c0_15 = arith.constant 0 : index
    %c8 = arith.constant 8 : index
    %44 = vector.load %arg6[%c0_15, %c8] : memref<32x32xf32, #tpu.memory_space<vmem>>, vector<32x8xf32>
    tpu.vector_store %arg6[%c0_15, %c8], %43 {strides = array<i32>} : memref<32x32xf32, #tpu.memory_space<vmem>>, vector<32x8xf32>,
    %45 = vector.extract_strided_slice %2 {offsets = [0, 16], sizes = [32, 8], strides = [1, 1]} : vector<32x96xf32> to vector<32x8xf32>
    %46 = vector.shape_cast %45 : vector<32x8xf32> to vector<4x8x8xf32>
    %47 = vector.extract_strided_slice %2 {offsets = [0, 48], sizes = [32, 8], strides = [1, 1]} : vector<32x96xf32> to vector<32x8xf32>
    %48 = vector.shape_cast %47 : vector<32x8xf32> to vector<4x8x8xf32>
    %49 = vector.extract_strided_slice %2 {offsets = [0, 80], sizes = [32, 8], strides = [1, 1]} : vector<32x96xf32> to vector<32x8xf32>
    %50 = vector.shape_cast %49 : vector<32x8xf32> to vector<4x8x8xf32>
    "tpu.trace_start"() <{level = 10 : i32, message = "gtd,gsd->gts"}> : () -> ()
    %cst_16 = arith.constant dense<0.000000e+00> : vector<4x8x8xf32>
    %51 = tpu.matmul %46, %48, %cst_16 {dimension_numbers = #tpu.dot_dimension_numbers<[2], [2], [1], [1], [0, 0, 0, 1, 1, 1], [0], [0]>} : vector<4x8x8xf32>, vector<4x8x8xf32>, vector<4x8x8xf32> -> vector<4x8x8xf32>
    "tpu.trace_stop"() : () -> ()
    %cst_17 = arith.constant 0.353553385 : f32
    %52 = vector.broadcast %cst_17 : f32 to vector<4x8x8xf32>
    %53 = arith.mulf %51, %52 : vector<4x8x8xf32>
    %cst_18 = arith.constant dense<0xFF800000> : vector<4x8xf32>
    %54 = vector.multi_reduction <maximumf>, %53, %cst_18 [2] : vector<4x8x8xf32> to vector<4x8xf32>
    %55 = vector.shape_cast %54 : vector<4x8xf32> to vector<4x8x1xf32>
    %56 = vector.broadcast %55 : vector<4x8x1xf32> to vector<4x8x8xf32>
    %57 = arith.subf %53, %56 : vector<4x8x8xf32>
    %58 = math.exp %57 : vector<4x8x8xf32>
    %cst_19 = arith.constant dense<0.000000e+00> : vector<4x8xf32>
    %59 = vector.multi_reduction <add>, %58, %cst_19 [2] : vector<4x8x8xf32> to vector<4x8xf32>
    %60 = vector.shape_cast %59 : vector<4x8xf32> to vector<4x8x1xf32>
    %61 = vector.broadcast %60 : vector<4x8x1xf32> to vector<4x8x8xf32>
    %62 = arith.divf %58, %61 : vector<4x8x8xf32>
    "tpu.trace_start"() <{level = 10 : i32, message = "gts,gsd->gtd"}> : () -> ()
    %cst_20 = arith.constant dense<0.000000e+00> : vector<4x8x8xf32>
    %63 = tpu.matmul %62, %50, %cst_20 {dimension_numbers = #tpu.dot_dimension_numbers<[2], [1], [1], [2], [0, 0, 0, 1, 1, 2], [0], [0]>} : vector<4x8x8xf32>, vector<4x8x8xf32>, vector<4x8x8xf32> -> vector<4x8x8xf32>
    "tpu.trace_stop"() : () -> ()
    %64 = vector.shape_cast %63 : vector<4x8x8xf32> to vector<32x8xf32>
    %c0_21 = arith.constant 0 : index
    %c16 = arith.constant 16 : index
    %65 = vector.load %arg6[%c0_21, %c16] : memref<32x32xf32, #tpu.memory_space<vmem>>, vector<32x8xf32>
    tpu.vector_store %arg6[%c0_21, %c16], %64 {strides = array<i32>} : memref<32x32xf32, #tpu.memory_space<vmem>>, vector<32x8xf32>,
    %66 = vector.extract_strided_slice %2 {offsets = [0, 24], sizes = [32, 8], strides = [1, 1]} : vector<32x96xf32> to vector<32x8xf32>
    %67 = vector.shape_cast %66 : vector<32x8xf32> to vector<4x8x8xf32>
    %68 = vector.extract_strided_slice %2 {offsets = [0, 56], sizes = [32, 8], strides = [1, 1]} : vector<32x96xf32> to vector<32x8xf32>
    %69 = vector.shape_cast %68 : vector<32x8xf32> to vector<4x8x8xf32>
    %70 = vector.extract_strided_slice %2 {offsets = [0, 88], sizes = [32, 8], strides = [1, 1]} : vector<32x96xf32> to vector<32x8xf32>
    %71 = vector.shape_cast %70 : vector<32x8xf32> to vector<4x8x8xf32>
    "tpu.trace_start"() <{level = 10 : i32, message = "gtd,gsd->gts"}> : () -> ()
    %cst_22 = arith.constant dense<0.000000e+00> : vector<4x8x8xf32>
    %72 = tpu.matmul %67, %69, %cst_22 {dimension_numbers = #tpu.dot_dimension_numbers<[2], [2], [1], [1], [0, 0, 0, 1, 1, 1], [0], [0]>} : vector<4x8x8xf32>, vector<4x8x8xf32>, vector<4x8x8xf32> -> vector<4x8x8xf32>
    "tpu.trace_stop"() : () -> ()
    %cst_23 = arith.constant 0.353553385 : f32
    %73 = vector.broadcast %cst_23 : f32 to vector<4x8x8xf32>
    %74 = arith.mulf %72, %73 : vector<4x8x8xf32>
    %cst_24 = arith.constant dense<0xFF800000> : vector<4x8xf32>
    %75 = vector.multi_reduction <maximumf>, %74, %cst_24 [2] : vector<4x8x8xf32> to vector<4x8xf32>
    %76 = vector.shape_cast %75 : vector<4x8xf32> to vector<4x8x1xf32>
    %77 = vector.broadcast %76 : vector<4x8x1xf32> to vector<4x8x8xf32>
    %78 = arith.subf %74, %77 : vector<4x8x8xf32>
    %79 = math.exp %78 : vector<4x8x8xf32>
    %cst_25 = arith.constant dense<0.000000e+00> : vector<4x8xf32>
    %80 = vector.multi_reduction <add>, %79, %cst_25 [2] : vector<4x8x8xf32> to vector<4x8xf32>
    %81 = vector.shape_cast %80 : vector<4x8xf32> to vector<4x8x1xf32>
    %82 = vector.broadcast %81 : vector<4x8x1xf32> to vector<4x8x8xf32>
    %83 = arith.divf %79, %82 : vector<4x8x8xf32>
    "tpu.trace_start"() <{level = 10 : i32, message = "gts,gsd->gtd"}> : () -> ()
    %cst_26 = arith.constant dense<0.000000e+00> : vector<4x8x8xf32>
    %84 = tpu.matmul %83, %71, %cst_26 {dimension_numbers = #tpu.dot_dimension_numbers<[2], [1], [1], [2], [0, 0, 0, 1, 1, 2], [0], [0]>} : vector<4x8x8xf32>, vector<4x8x8xf32>, vector<4x8x8xf32> -> vector<4x8x8xf32>
    "tpu.trace_stop"() : () -> ()
    %85 = vector.shape_cast %84 : vector<4x8x8xf32> to vector<32x8xf32>
    %c0_27 = arith.constant 0 : index
    %c24 = arith.constant 24 : index
    %86 = vector.load %arg6[%c0_27, %c24] : memref<32x32xf32, #tpu.memory_space<vmem>>, vector<32x8xf32>
    tpu.vector_store %arg6[%c0_27, %c24], %85 {strides = array<i32>} : memref<32x32xf32, #tpu.memory_space<vmem>>, vector<32x8xf32>,
    %c0_28 = arith.constant 0 : index
    %c0_29 = arith.constant 0 : index
    %87 = vector.load %arg6[%c0_28, %c0_29] : memref<32x32xf32, #tpu.memory_space<vmem>>, vector<32x32xf32>
    %c0_30 = arith.constant 0 : index
    %c0_31 = arith.constant 0 : index
    %88 = vector.load %arg3[%c0_30, %c0_31] : memref<32x32xf32, #tpu.memory_space<vmem>>, vector<32x32xf32>
    %cst_32 = arith.constant dense<0.000000e+00> : vector<32x32xf32>
    %89 = tpu.matmul %87, %88, %cst_32 {dimension_numbers = #tpu.dot_dimension_numbers<[1], [0], [0], [1], [0, 0, 1, 1], [], []>} : vector<32x32xf32>, vector<32x32xf32>, vector<32x32xf32> -> vector<32x32xf32>
    %c0_33 = arith.constant 0 : index
    %c0_34 = arith.constant 0 : index
    %90 = vector.load %arg4[%c0_33, %c0_34] : memref<1x32xf32, #tpu.memory_space<vmem>>, vector<1x32xf32>
    %91 = vector.broadcast %90 : vector<1x32xf32> to vector<32x32xf32>
    %92 = arith.addf %89, %91 : vector<32x32xf32>
    %c0_35 = arith.constant 0 : index
    %c0_36 = arith.constant 0 : index
    %93 = vector.load %arg5[%c0_35, %c0_36] : memref<32x32xf32, #tpu.memory_space<vmem>>, vector<32x32xf32>
    tpu.vector_store %arg5[%c0_35, %c0_36], %92 {strides = array<i32>} : memref<32x32xf32, #tpu.memory_space<vmem>>, vector<32x32xf32>,
    return
  }
  func.func @transform_0(%arg0: i32) -> (i32, i32) {
    %c0_i32 = arith.constant 0 : i32
    %c0_i32_0 = arith.constant 0 : i32
    return %arg0, %c0_i32 : i32, i32
  }
  func.func @transform_1(%arg0: i32) -> (i32, i32) {
    %c0_i32 = arith.constant 0 : i32
    %c0_i32_0 = arith.constant 0 : i32
    %c0_i32_1 = arith.constant 0 : i32
    return %c0_i32, %c0_i32_0 : i32, i32
  }
  func.func @transform_2(%arg0: i32) -> (i32, i32) {
    %c0_i32 = arith.constant 0 : i32
    %c0_i32_0 = arith.constant 0 : i32
    %c0_i32_1 = arith.constant 0 : i32
    return %c0_i32, %c0_i32_0 : i32, i32
  }
  func.func @transform_3(%arg0: i32) -> (i32, i32) {
    %c0_i32 = arith.constant 0 : i32
    %c0_i32_0 = arith.constant 0 : i32
    %c0_i32_1 = arith.constant 0 : i32
    return %c0_i32, %c0_i32_0 : i32, i32
  }
  func.func @transform_4(%arg0: i32) -> (i32, i32) {
    %c0_i32 = arith.constant 0 : i32
    %c0_i32_0 = arith.constant 0 : i32
    return %arg0, %c0_i32 : i32, i32
  }
}

</mosaic_0001>

<bundles_post_ra>
// kernel: tpu_custom_call.1
= control target key start
LH: loop header
LB: loop body
LE: loop exit
PB: predicated region body
PF: predicated region fallthrough
CT: control target
= control target key end

     0   :  { %9 = vsyncpa [#allocation4], 0  ;;  %s4489_s0 = inlined_call_operand.hbm [shape: f32[64,96], index: 0, kind: input, shape index: {}]   ;;  %s4490_s1 = inlined_call_operand.hbm [shape: f32[96,96], index: 1, kind: input, shape index: {}]   ;;  %s4491_s2 = inlined_call_operand.hbm [shape: f32[32,32], index: 2, kind: input, shape index: {}]   ;;  %s4492_s3 = inlined_call_operand.vmem [shape: f32[1,32], index: 3, kind: input, shape index: {}]   ;;  %s4493_s4 = inlined_call_operand.vmem [shape: f32[64,32], index: 4, kind: output, shape index: {}]  }
   0x1   :  { %11 = vsyncpa [#allocation4 + $0x1], 0 }
   0x2   :  { %12 = vsyncpa [#allocation6], 0  ;;  %s3999_s15 = smov 0   ;;  %s4001_s16 = smov 0  }
   0x3   :  { %s4003_s17 = smov 0   ;;  %s4005_s18 = smov 0  }
   0x4 LB: > { %s3286_s19 = sadd.s32 4294967295, %s3951_s18   ;;  %p38_p0 = scmp.ne.s32.totalorder %s3943_s16, %s3939_s15  ;;  %s3951_s18 = sphi %s4005_s18, %s4509_s18   ;;  %s3947_s17 = sphi %s4003_s17, %s4508_s17   ;;  %s3943_s16 = sphi %s4001_s16, %s4507_s16   ;;  %s3939_s15 = sphi %s3999_s15, %s4506_s15  }
   0x5   : > { %p4021_p1 = scmp.eq.s32.totalorder %s3286_s19, 0  ;;  %p3288_p2 = scmp.ge.s32.totalorder %s3951_s18, 1 }
   0x6   : > { %p138_p3 = scmp.lt.s32.totalorder %s3951_s18, 3  ;;  %s3953_s23 = smov [#allocation5]  }
   0x7   : > { %s4498_s20 = scalar_select %p4021_p1, 1, 0 }
   0x8   : > { %p4029_p4 = por %p4021_p1, %p38_p0  ;;  %p4033_p5 = pnand %p3288_p2, %p138_p3 }
   0x9   : > { %s150_s24 = sshll.u32 %s3953_s23, 4  ;;  %s3954_s26 = smov [#allocation7]   ;;  %s151_s24 = int_to_ptr.vmem [resolvable:$true] %s150_s24 }
   0xa   : > { %s4499_s21 = scalar_select %p4029_p4, 1, 0 }
   0xb   : > { %s4500_s22 = scalar_select %p4033_p5, 1, 0 }
   0xc   : > { %p3695_p6 = pneg %p4033_p5  ;;  %s163_s27 = sshll.u32 %s3954_s26, 4  ;;  %s4045_s27 = int_to_ptr.vmem [resolvable:$true] %s163_s27 }
   0xd   : > { %s3827_s30 = scalar_lea.hbm %s4490_s1, 1536 }
   0xe   : > { %p4041_p7 = pnand %p3695_p6, %p4021_p1  ;;  %p3828_p8 = scmp.ne.s32.totalorder %s4490_s1, %s3827_s30 }
   0xf   : > { %p3834_p12 = scmp.lt.u32.totalorder %s3827_s30, %s4490_s1 }
  0x10   : > { %p3829_p9 = pneg %p4041_p7 }
  0x12   : > { %p3830_p10 = pnand %p3829_p9, %p3828_p8 }
  0x14   : > { %p3831_p11 = pneg %p3830_p10 }
  0x16   : > { %p3836_p13 = pnand %p3834_p12, %p3831_p11 }
  0x18   : > { %3839 = shalt.err (!%p3836_p13)
}
  0x19   : > { %s3840_s9 = scalar_lea.vmem %s151_s24, 1536  ;;  %p3848_p6 = scmp.lt.s32.totalorder %s151_s24, %s151_s24 }
  0x1a   : > { %p3841_p0 = scmp.ne.s32.totalorder %s151_s24, %s3840_s9  ;;  %p3849_p1 = scmp.lt.s32.totalorder %s3840_s9, %s3840_s9 }
  0x1c   : > { %p3843_p2 = pnand %p3841_p0, %p3829_p9  ;;  %p3850_p4 = por %p3849_p1, %p3848_p6 }
  0x1e   : > { %p3844_p3 = pneg %p3843_p2 }
  0x20   : > { %p3851_p5 = pnand %p3850_p4, %p3844_p3 }
  0x22   : > { %3854 = shalt.err (!%p3851_p5)
}
  0x23   : > { %s3955_s10 = smov 128   ;;  %s3956_s11 = smov 8  }
  0x24   : > { %3698 = dma.hbm_to_vmem [thread:$0]  (!%p4041_p7), %s4490_s1, 1536, %s151_s24, [#allocation6], %s3955_s10, %s3955_s10, %s3956_s11  }
  0x25   : > { %s3855_s23 = scalar_lea.hbm %s4491_s2, 512 }
  0x26   : > { %p3856_p1 = scmp.ne.s32.totalorder %s4491_s2, %s3855_s23  ;;  %p3862_p8 = scmp.lt.u32.totalorder %s3855_s23, %s4491_s2 }
  0x28   : > { %p3858_p4 = pnand %p3856_p1, %p3829_p9 }
  0x2a   : > { %p3859_p5 = pneg %p3858_p4 }
  0x2c   : > { %p3864_p10 = pnand %p3862_p8, %p3859_p5 }
  0x2e   : > { %3867 = shalt.err (!%p3864_p10)
}
  0x2f   : > { %s3868_s24 = scalar_lea.vmem %s4045_s27, 512  ;;  %p3876_p0 = scmp.lt.s32.totalorder %s4045_s27, %s4045_s27 }
  0x30   : > { %p3869_p11 = scmp.ne.s32.totalorder %s4045_s27, %s3868_s24  ;;  %p3877_p2 = scmp.lt.s32.totalorder %s3868_s24, %s3868_s24 }
  0x32   : > { %p3871_p12 = pnand %p3869_p11, %p3829_p9  ;;  %p3878_p3 = por %p3877_p2, %p3876_p0 }
  0x34   : > { %p3872_p13 = pneg %p3871_p12 }
  0x36   : > { %p3879_p6 = pnand %p3878_p3, %p3872_p13 }
  0x38   : > { %3882 = shalt.err (!%p3879_p6)
}
  0x39   : > { %3701 = dma.hbm_to_vmem [thread:$0]  (!%p4041_p7), %s4491_s2, 512, %s4045_s27, [#allocation6], %s3955_s10, %s3955_s10, %s3956_s11  }
  0x3a   : > { %s4101_s7 = sadd.s32 1, %s3951_s18   ;;  %s25_s25 = sadd.s32 1, %s3947_s17 }
  0x3b   : > { %s22_s8 = ssub.s32 %s3951_s18, %s4101_s7  ;;  %p32_p9 = scmp.ne.s32.totalorder %s3947_s17, %s3943_s16 }
  0x3c   : > { %p23_p1 = scmp.eq.s32.totalorder %s22_s8, 0  ;;  %p33_p4 = scmp.eq.s32.totalorder %s3951_s18, 0 }
  0x3d   : > { %p3708_p5 = scmp.lt.s32.totalorder %s3951_s18, 2  ;;  %s180_s9 = sand.u32 1, %s3947_s17  }
  0x3e   : > { %s4112_s12 = scalar_select %p23_p1, %s3947_s17, %s25_s25  }
  0x3f   : > { %p34_p8 = por %p33_p4, %p32_p9  ;;  %s3292_s13 = sshll.u32 %s180_s9, 5 }
  0x40   : > { %s3360_s14 = sshll.u32 %s3951_s18, 9  ;;  %s184_s27 = scalar_lea.vmem [#allocation3], %s3292_s13 }
  0x41   : > { %s4118_s26 = scalar_lea.hbm %s4489_s0, %s3360_s14  ;;  %s191_s28 = sshll.u32 %s184_s27, 4  ;;  %s4124_s28 = int_to_ptr.vmem [resolvable:$true] %s191_s28 }
  0x42   : > { %p4120_p7 = pnand %p3708_p5, %p34_p8  ;;  %s4126_s30 = scalar_lea.sflag [#allocation4], %s180_s9 }
  0x43   : > { %s3883_s24 = scalar_lea.hbm %s4118_s26, 512  ;;  %s3888_s25 = scalar_lea.hbm %s4489_s0, 1024 }
  0x44   : > { %p3884_p10 = scmp.ne.s32.totalorder %s4118_s26, %s3883_s24  ;;  %p3885_p11 = pneg %p4120_p7 }
  0x45   : > { %p3889_p0 = scmp.lt.u32.totalorder %s4118_s26, %s4489_s0  ;;  %p3890_p2 = scmp.lt.u32.totalorder %s3888_s25, %s3883_s24 }
  0x46   : > { %p3886_p12 = pnand %p3885_p11, %p3884_p10  ;;  %p3892_p6 = scmp.lt.u32.totalorder %s3883_s24, %s4118_s26 }
  0x47   : > { %p3891_p3 = por %p3890_p2, %p3889_p0 }
  0x48   : > { %p3887_p13 = pneg %p3886_p12 }
  0x49   : > { %p3893_p9 = por %p3892_p6, %p3891_p3 }
  0x4b   : > { %p3894_p1 = pnand %p3893_p9, %p3887_p13 }
  0x4d   : > { %3897 = shalt.err (!%p3894_p1)
}
  0x4e   : > { %s3898_s9 = scalar_lea.vmem %s4124_s28, 512  ;;  %s3957_s14 = smov [#allocation3]  }
  0x4f   : > { %p3899_p4 = scmp.ne.s32.totalorder %s4124_s28, %s3898_s9  ;;  %s3903_s15 = sshll.u32 %s3957_s14, 4  ;;  %s3904_s15 = int_to_ptr.vmem [resolvable:$false] %s3903_s15 }
  0x50   : > { %s3905_s23 = scalar_lea.vmem %s3904_s15, 1024  ;;  %p3906_p10 = scmp.lt.s32.totalorder %s4124_s28, %s3904_s15 }
  0x51   : > { %p3901_p5 = pnand %p3899_p4, %p3885_p11  ;;  %p3907_p12 = scmp.lt.s32.totalorder %s3905_s23, %s3898_s9 }
  0x53   : > { %p3902_p8 = pneg %p3901_p5  ;;  %p3908_p0 = por %p3907_p12, %p3906_p10 }
  0x55   : > { %p3909_p2 = pnand %p3908_p0, %p3902_p8 }
  0x57   : > { %3912 = shalt.err (!%p3909_p2)
}
  0x58   : > { %3705 = dma.hbm_to_vmem [thread:$0]  (!%p4120_p7), %s4118_s26, 512, %s4124_s28, %s4126_s30, %s3955_s10, %s3955_s10, %s3956_s11  }
  0x59   : > { %p4503_p11 = scmp.ne.s32.totalorder %s4500_s22, 0 }
  0x5a   : > { %s205_s27 = sand.u32 (!%p4503_p11), 1, %s3943_s16   ;;  %p4504_p13 = scmp.ne.s32.totalorder (!%p4503_p11), %s4499_s21, 0 }
  0x5b   : > { %203 = sbr.rel (%p4503_p11) target bundleno = 3306 (0xcea), region = 36  ;;  %s3296_s24 = sshll.u32 (!%p4503_p11), %s205_s27, 5 }
  0x5c   : > { %s206_s5 = scalar_lea.sflag (!%p4503_p11), [#allocation4], %s205_s27  ;;  %s4160_s6 = scalar_lea.vmem (!%p4503_p11), [#allocation3], %s3296_s24 }
  0x62   : > { %3930 = dma.done.wait (%p4504_p13), %s206_s5, 512  }
  0x63   : > { %3932 = vsyncadd (%p4504_p13), %s206_s5, 4294966784  ;;  %p4505_p3 = scmp.ne.s32.totalorder %s4498_s20, 0 }
  0x65   : > { %3934 = dma.done.wait (%p4505_p3), [#allocation6], 2048  }
  0x66   : > { %3936 = vsyncadd (%p4505_p3), [#allocation6], 4294965248  ;;  %v253_v0 = vld [vmem:[#allocation5] sm:$0xff]  ;;  %v254_v1 = vld [vmem:[#allocation5 + $0x8] sm:$0xff]  ;;  %vm265_vm0 = vcmask 785408   ;;  %v3958_v22 = vmov 0.0  }
  0x67   : > { %v255_v2 = vld [vmem:[#allocation5 + $0x10] sm:$0xff]  ;;  %v3653_v3 = vpack.c.bf16 %v254_v1, %v253_v0  ;;  %v256_v4 = vld [vmem:[#allocation5 + $0x18] sm:$0xff]  ;;  %v257_v6 = vld [vmem:[#allocation5 + $0x20] sm:$0xff]  ;;  %3484 = vmatprep.subr.mxu1 %v3958_v22  ;;  %vm3959_vm1 = vmmov 0   ;;  %s3960_s20 = smov 96   ;;  %vm366_vm2 = vcmask 64512  }
  0x68   : > { %v3657_v5 = vpack.c.bf16 %v256_v4, %v255_v2  ;;  %v258_v7 = vld [vmem:[#allocation5 + $0x28] sm:$0xff]  ;;  %v249_v8 = vld [vmem:[%s4160_s6] sm:$0xff]  ;;  %v259_v10 = vld [vmem:[#allocation5 + $0x30] sm:$0xff]  ;;  %3486 = vmatprep.mubr.msk.f32.mxu1 %vm3959_vm1, %v3958_v22  ;;  %s3961_s21 = smov 64   ;;  %s3962_s22 = smov 88   ;;  %vm1708_vm3 = vcmask 130112  }
  0x69   : > { %3654 = vmatprep.subr.bf16.mxu0 %v3653_v3  ;;  %v3661_v9 = vpack.c.bf16 %v258_v7, %v257_v6  ;;  %3473 = vmatprep.mubr.msk.f32.mxu0 %vm265_vm0, %v249_v8  ;;  %v260_v11 = vld [vmem:[#allocation5 + $0x38] sm:$0xff]  ;;  %v261_v13 = vld [vmem:[#allocation5 + $0x40] sm:$0xff]  ;;  %v262_v14 = vld [vmem:[#allocation5 + $0x48] sm:$0xff]  ;;  %s3963_s10 = smov 120   ;;  %s3964_s11 = smov 56   ;;  %vm2393_vm4 = vcmask 195712  }
  0x6a   : > { %3656 = vmatpush3.bf16.msra.mxu0 %v3653_v3  ;;  %v3665_v12 = vpack.c.bf16 %v260_v11, %v259_v10  ;;  %v3669_v15 = vpack.c.bf16 %v262_v14, %v261_v13  ;;  %v263_v16 = vld [vmem:[#allocation5 + $0x50] sm:$0xff]  ;;  %v264_v17 = vld [vmem:[#allocation5 + $0x58] sm:$0xff]  ;;  %v250_v19 = vld [vmem:[%s4160_s6 + $0x8] sm:$0xff]  ;;  %s3965_s26 = smov 80   ;;  %s3966_s28 = smov 112   ;;  %vm3078_vm5 = vcmask 261312  }
  0x6b   : > { %3658 = vmatprep.subr.bf16.mxu0 %v3657_v5  ;;  %v3673_v18 = vpack.c.bf16 %v264_v17, %v263_v16  ;;  %v251_v20 = vld [vmem:[%s4160_s6 + $0x10] sm:$0xff]  ;;  %v252_v21 = vld [vmem:[%s4160_s6 + $0x18] sm:$0xff]  ;;  %s3967_s29 = smov 48   ;;  %s3968_s30 = smov 72   ;;  %vm3098_vm6 = vcmask 261120  }
  0x6c   : > { %s3969_s25 = smov 104   ;;  %s3970_s8 = smov 40  }
  0x6d   : > { %s3971_s13 = smov 8   ;;  %s3972_s9 = smov 16  }
  0x6e   : > { %3660 = vmatpush3.bf16.msra.mxu0 %v3657_v5  ;;  %s3973_s14 = smov 24   ;;  %s3299_s15 = sshll.u32 %s3286_s19, 2 }
  0x6f   : > { %3662 = vmatprep.subr.bf16.mxu0 %v3661_v9  ;;  %p244_p7 = scmp.lt.s32.totalorder %s3299_s15, 7 }
  0x71   : > { %s4511_s15 = smov (!%p244_p7, %s3299_s15), 7 }
  0x72   : > { %3664 = vmatpush3.bf16.msra.mxu0 %v3661_v9  ;;  %s3300_s23 = sshll.u32 %s4511_s15, 3 }
  0x73   : > { %3666 = vmatprep.subr.bf16.mxu0 %v3665_v12 }
  0x76   : > { %3668 = vmatpush3.bf16.msra.mxu0 %v3665_v12 }
  0x77   : > { %3670 = vmatprep.subr.bf16.mxu0 %v3669_v15 }
  0x7a   : > { %3672 = vmatpush3.bf16.msra.mxu0 %v3669_v15 }
  0x7b   : > { %3674 = vmatprep.subr.bf16.mxu0 %v3673_v18 }
  0x7e   : > { %3676 = vmatpush3.bf16.msra.mxu0 %v3673_v18 }
  0x7f   : > { %3479 = vmatprep.subr.mxu0 %v3958_v22 }
  0x81   : > { %3474 = vmatmul.mubr.msk.f32.vlgmr.msra.gmra.mrb[0].mxu0 %vm265_vm0, %v250_v19 }
  0x82   : > { %3476 = vmatprep.mubr.msk.f32.mxu0 %vm265_vm0, %v251_v20 }
  0x85   : > { %3477 = vmatmul.mubr.msk.f32.gmra.mrb[2].mxu0 %vm265_vm0, %v252_v21 }
  0x86   : > { %3481 = vmatprep.mubr.msk.f32.mxu0 %vm3959_vm1, %v3958_v22 }
 0x154   : > { %v4184_v23 = vpop.f32.mrb[0].mxu0 }
 0x155   : > { %v4186_v24 = vpop.f32.mrb[1].mxu0 }
 0x156   : > { %364 = vrot.lane.b32.xlu0 %v4186_v24, %s3960_s20 }
 0x158   : > { %v4189_v25 = vpop.f32.mrb[2].mxu0 }
 0x159   : > { %v4191_v26 = vpop.f32.mrb[3].mxu0 }
 0x15a   : > { %442 = vrot.lane.b32.xlu0 %v4184_v23, %s3960_s20  ;;  %519 = vrot.lane.b32.xlu1 %v4191_v26, %s3960_s20 }
 0x15e   : > { %596 = vrot.lane.b32.xlu1 %v4189_v25, %s3960_s20  ;;  %s247_s20 = scalar_lea.vmem %s4493_s4, %s3300_s23 }
 0x1c8   : > { %v365_v27 = vpop.permute.xlu0 %364 }
 0x1c9   : > { %3480 = vmatpush3.xpose.msk.msra.mxu0 %vm366_vm2, %v365_v27 }
 0x1ca   : > { %3514 = vmatprep.subr.mxu0 %v3958_v22 }
 0x1cc   : > { %3482 = vmatmul.mubr.msk.f32.vlgmr.msra.gmra.mrb[4].mxu0 %vm366_vm2, %v4186_v24  ;;  %v443_v28 = vpop.permute.xlu0 %442  ;;  %v520_v29 = vpop.permute.xlu1 %519 }
 0x1cd   : > { %3485 = vmatpush3.xpose.msk.msra.mxu1 %vm366_vm2, %v443_v28  ;;  %3516 = vmatprep.mubr.msk.f32.mxu0 %vm3959_vm1, %v3958_v22 }
 0x1ce   : > { %3489 = vmatprep.subr.mxu1 %v3958_v22 }
 0x1d0   : > { %3487 = vmatmul.mubr.msk.f32.vlgmr.msra.gmra.mrb[0].mxu1 %vm366_vm2, %v4184_v23  ;;  %v597_v30 = vpop.permute.xlu1 %596 }
 0x1d1   : > { %3490 = vmatpush3.xpose.msk.msra.mxu1 %vm366_vm2, %v520_v29  ;;  %3491 = vmatprep.mubr.msk.f32.mxu1 %vm3959_vm1, %v3958_v22 }
 0x1d2   : > { %3494 = vmatprep.subr.mxu1 %v3958_v22 }
 0x1d4   : > { %3492 = vmatmul.mubr.msk.f32.vlgmr.msra.gmra.mrb[2].mxu1 %vm366_vm2, %v4191_v26 }
 0x1d5   : > { %3495 = vmatpush3.xpose.msk.msra.mxu1 %vm366_vm2, %v597_v30  ;;  %3496 = vmatprep.mubr.msk.f32.mxu1 %vm3959_vm1, %v3958_v22 }
 0x1d6   : > { %3499 = vmatprep.subr.mxu1 %v3958_v22 }
 0x1d8   : > { %3497 = vmatmul.mubr.msk.f32.vlgmr.msra.gmra.mrb[4].mxu1 %vm366_vm2, %v4189_v25 }
 0x1d9   : > { %3501 = vmatprep.mubr.msk.f32.mxu1 %vm3959_vm1, %v3958_v22 }
 0x29f   : > { %v437_v31 = vpop.f32.mrb[4].mxu0 }
 0x2a0   : > { %v672_v32 = vmul.f32 0.35355338, %v437_v31  ;;  %v3483_v33 = vpop.f32.mrb[5].mxu0 }
 0x2a2   : > { %v676_v34 = vsel %vm366_vm2, %v672_v32, -inf }
 0x2a3   : > { %v514_v35 = vpop.f32.mrb[0].mxu1  ;;  %677 = vmax.xlane.f32.xlu0 %v676_v34 }
 0x2a4   : > { %v673_v36 = vmul.f32 0.35355338, %v514_v35  ;;  %v3488_v37 = vpop.f32.mrb[1].mxu1 }
 0x2a6   : > { %v679_v38 = vsel %vm366_vm2, %v673_v36, -inf }
 0x2a7   : > { %680 = vmax.xlane.f32.xlu1 %v679_v38  ;;  %v591_v39 = vpop.f32.mrb[2].mxu1 }
 0x2a8   : > { %v674_v40 = vmul.f32 0.35355338, %v591_v39  ;;  %v3493_v41 = vpop.f32.mrb[3].mxu1 }
 0x2aa   : > { %v682_v42 = vsel %vm366_vm2, %v674_v40, -inf }
 0x2ab   : > { %v668_v43 = vpop.f32.mrb[4].mxu1  ;;  %683 = vmax.xlane.f32.xlu0 %v682_v42 }
 0x2ac   : > { %v675_v44 = vmul.f32 0.35355338, %v668_v43  ;;  %v3498_v45 = vpop.f32.mrb[5].mxu1 }
 0x2ae   : > { %v685_v46 = vsel %vm366_vm2, %v675_v44, -inf }
 0x2af   : > { %686 = vmax.xlane.f32.xlu0 %v685_v46 }
 0x2b8   : > { %720 = vrot.lane.b32.xlu1 %v4186_v24, %s3961_s21 }
 0x2bc   : > { %872 = vrot.lane.b32.xlu1 %v4191_v26, %s3961_s21 }
 0x2c0   : > { %948 = vrot.lane.b32.xlu1 %v4189_v25, %s3961_s21 }
 0x2c4   : > { %1108 = vrot.lane.b32.xlu1 %v4184_v23, %s3962_s22 }
 0x2c5   : > { %796 = vrot.lane.b32.xlu0 %v4184_v23, %s3961_s21 }
 0x2c9   : > { %1030 = vrot.lane.b32.xlu0 %v4186_v24, %s3962_s22 }
 0x330   : > { %v678_v47 = vpop.xlane.xlu0 %677 }
 0x331   : > { %v688_v48 = vsub.f32 %v672_v32, %v678_v47 }
 0x333   : > { %v692_v49 = vmul.f32 1.442695, %v688_v48 }
 0x334   : > { %v681_v50 = vpop.xlane.xlu1 %680 }
 0x335   : > { %3763 = vpow2.f32 %v692_v49  ;;  %v689_v51 = vsub.f32 %v673_v36, %v681_v50 }
 0x337   : > { %v694_v52 = vmul.f32 1.442695, %v689_v51 }
 0x338   : > { %v721_v53 = vpop.permute.xlu1 %720  ;;  %v684_v54 = vpop.xlane.xlu0 %683 }
 0x339   : > { %3765 = vpow2.f32 %v694_v52  ;;  %v690_v55 = vsub.f32 %v674_v40, %v684_v54  ;;  %3500 = vmatpush3.msra.mxu1 %v721_v53 }
 0x33a   : > { %3504 = vmatprep.subr.mxu1 %v3958_v22 }
 0x33b   : > { %v696_v56 = vmul.f32 1.442695, %v690_v55 }
 0x33c   : > { %v873_v57 = vpop.permute.xlu1 %872  ;;  %v687_v58 = vpop.xlane.xlu0 %686 }
 0x33d   : > { %3767 = vpow2.f32 %v696_v56  ;;  %v691_v59 = vsub.f32 %v675_v44, %v687_v58 }
 0x33f   : > { %v3764_v60 = vpop.eup %3763  ;;  %v698_v61 = vmul.f32 1.442695, %v691_v59 }
 0x340   : > { %v949_v62 = vpop.permute.xlu1 %948  ;;  %v700_v63 = vsel %vm366_vm2, %v3764_v60, 0.0  ;;  %v797_v6 = vpop.permute.xlu0 %796 }
 0x341   : > { %3769 = vpow2.f32 %v698_v61  ;;  %3515 = vmatpush3.msra.mxu0 %v949_v62  ;;  %701 = vadd.xlane.f32.xlu1 %v700_v63 }
 0x342   : > { %3524 = vmatprep.subr.mxu0 %v3958_v22 }
 0x343   : > { %v3766_v0 = vpop.eup %3765 }
 0x344   : > { %v703_v1 = vsel %vm366_vm2, %v3766_v0, 0.0  ;;  %v1109_v7 = vpop.permute.xlu1 %1108  ;;  %v1031_v8 = vpop.permute.xlu0 %1030 }
 0x345   : > { %704 = vadd.xlane.f32.xlu0 %v703_v1 }
 0x347   : > { %v3768_v2 = vpop.eup %3767 }
 0x348   : > { %v706_v3 = vsel %vm366_vm2, %v3768_v2, 0.0 }
 0x349   : > { %707 = vadd.xlane.f32.xlu1 %v706_v3 }
 0x34b   : > { %v3770_v4 = vpop.eup %3769 }
 0x34c   : > { %v709_v5 = vsel %vm366_vm2, %v3770_v4, 0.0 }
 0x34d   : > { %710 = vadd.xlane.f32.xlu0 %v709_v5 }
 0x35a   : > { %1106 = vrot.lane.b32.xlu1 %v4184_v23, %s3963_s10 }
 0x35e   : > { %1264 = vrot.lane.b32.xlu1 %v4189_v25, %s3962_s22 }
 0x362   : > { %1262 = vrot.lane.b32.xlu1 %v4189_v25, %s3963_s10 }
 0x363   : > { %1028 = vrot.lane.b32.xlu0 %v4186_v24, %s3963_s10 }
 0x367   : > { %1186 = vrot.lane.b32.xlu0 %v4191_v26, %s3962_s22 }
 0x36b   : > { %1184 = vrot.lane.b32.xlu0 %v4191_v26, %s3963_s10 }
 0x3ce   : > { %v702_v9 = vpop.xlane.xlu1 %701 }
 0x3cf   : > { %3771 = vrcp.f32 %v702_v9 }
 0x3d2   : > { %v705_v10 = vpop.xlane.xlu0 %704 }
 0x3d3   : > { %3773 = vrcp.f32 %v705_v10 }
 0x3d6   : > { %v708_v11 = vpop.xlane.xlu1 %707 }
 0x3d7   : > { %3775 = vrcp.f32 %v708_v11 }
 0x3d9   : > { %v3772_v12 = vpop.eup %3771 }
 0x3da   : > { %v713_v13 = vmul.f32 %v3772_v12, %v3764_v60  ;;  %v711_v14 = vpop.xlane.xlu0 %710  ;;  %v1107_v20 = vpop.permute.xlu1 %1106 }
 0x3db   : > { %3777 = vrcp.f32 %v711_v14 }
 0x3dc   : > { %3502 = vmatmul.mubr.msk.f32.vlgmr.msra.gmra.mrb[6].mxu1 %vm366_vm2, %v713_v13 }
 0x3dd   : > { %v3774_v15 = vpop.eup %3773  ;;  %3505 = vmatpush3.msra.mxu1 %v797_v6  ;;  %3506 = vmatprep.mubr.msk.f32.mxu1 %vm3959_vm1, %v3958_v22 }
 0x3de   : > { %v715_v16 = vmul.f32 %v3774_v15, %v3766_v0  ;;  %3509 = vmatprep.subr.mxu1 %v3958_v22  ;;  %v1029_v19 = vpop.permute.xlu0 %1028  ;;  %v1265_v29 = vpop.permute.xlu1 %1264 }
 0x3e0   : > { %3507 = vmatmul.mubr.msk.f32.vlgmr.msra.gmra.mrb[8].mxu1 %vm366_vm2, %v715_v16 }
 0x3e1   : > { %v3776_v17 = vpop.eup %3775  ;;  %3510 = vmatpush3.msra.mxu1 %v873_v57  ;;  %3511 = vmatprep.mubr.msk.f32.mxu1 %vm3959_vm1, %v3958_v22 }
 0x3e2   : > { %v717_v18 = vmul.f32 %v3776_v17, %v3768_v2  ;;  %3519 = vmatprep.subr.mxu1 %v3958_v22  ;;  %v1187_v28 = vpop.permute.xlu0 %1186  ;;  %v1263_v31 = vpop.permute.xlu1 %1262 }
 0x3e4   : > { %3512 = vmatmul.mubr.msk.f32.vlgmr.msra.gmra.mrb[10].mxu1 %vm366_vm2, %v717_v18 }
 0x3e5   : > { %v3778_v21 = vpop.eup %3777  ;;  %3521 = vmatprep.mubr.msk.f32.mxu1 %vm3959_vm1, %v3958_v22 }
 0x3e6   : > { %v719_v27 = vmul.f32 %v3778_v21, %v3770_v4  ;;  %v1185_v30 = vpop.permute.xlu0 %1184 }
 0x3e8   : > { %3520 = vmatpush3.xpose.msk.msra.mxu1 %vm366_vm2, %v1031_v8  ;;  %3517 = vmatmul.mubr.msk.f32.vlgmr.msra.gmra.mrb[6].mxu0 %vm366_vm2, %v719_v27 }
 0x3e9   : > { %3525 = vmatpush3.xpose.msk.msra.mxu0 %vm366_vm2, %v1109_v7  ;;  %3529 = vmatprep.subr.mxu1 %v3958_v22 }
 0x3ea   : > { %3526 = vmatprep.mubr.msk.f32.mxu0 %vm3959_vm1, %v3958_v22  ;;  %3534 = vmatprep.subr.mxu0 %v3958_v22 }
 0x3eb   : > { %3522 = vmatmul.mubr.msk.f32.vlgmr.msra.gmra.mrb[12].mxu1 %vm366_vm2, %v1029_v19 }
 0x3ec   : > { %3530 = vmatpush3.xpose.msk.msra.mxu1 %vm366_vm2, %v1187_v28  ;;  %3527 = vmatmul.mubr.msk.f32.vlgmr.msra.gmra.mrb[8].mxu0 %vm366_vm2, %v1107_v20 }
 0x3ed   : > { %3535 = vmatpush3.xpose.msk.msra.mxu0 %vm366_vm2, %v1265_v29  ;;  %3531 = vmatprep.mubr.msk.f32.mxu1 %vm3959_vm1, %v3958_v22 }
 0x3ee   : > { %3536 = vmatprep.mubr.msk.f32.mxu0 %vm3959_vm1, %v3958_v22  ;;  %3539 = vmatprep.subr.mxu1 %v3958_v22 }
 0x3ef   : > { %3532 = vmatmul.mubr.msk.f32.vlgmr.msra.gmra.mrb[14].mxu1 %vm366_vm2, %v1185_v30  ;;  %3544 = vmatprep.subr.mxu0 %v3958_v22 }
 0x3f0   : > { %3537 = vmatmul.mubr.msk.f32.vlgmr.msra.gmra.mrb[10].mxu0 %vm366_vm2, %v1263_v31  ;;  %3541 = vmatprep.mubr.msk.f32.mxu1 %vm3959_vm1, %v3958_v22 }
 0x3f1   : > { %3546 = vmatprep.mubr.msk.f32.mxu0 %vm3959_vm1, %v3958_v22 }
 0x4af   : > { %v792_v32 = vpop.f32.mrb[6].mxu1 }
 0x4b0   : > { %1024 = vst.msk [vmem:[#allocation2] sm:$0xff] %vm366_vm2, %v792_v32  ;;  %v3503_v33 = vpop.f32.mrb[7].mxu1 }
 0x4b3   : > { %v868_v34 = vpop.f32.mrb[8].mxu1 }
 0x4b4   : > { %1025 = vst.msk [vmem:[#allocation2 + $0x8] sm:$0xff] %vm366_vm2, %v868_v34  ;;  %v3508_v35 = vpop.f32.mrb[9].mxu1 }
 0x4b7   : > { %v944_v36 = vpop.f32.mrb[10].mxu1 }
 0x4b8   : > { %1026 = vst.msk [vmem:[#allocation2 + $0x10] sm:$0xff] %vm366_vm2, %v944_v36  ;;  %v3513_v37 = vpop.f32.mrb[11].mxu1 }
 0x4bb   : > { %v1020_v38 = vpop.f32.mrb[6].mxu0 }
 0x4bc   : > { %1027 = vst.msk [vmem:[#allocation2 + $0x18] sm:$0xff] %vm366_vm2, %v1020_v38  ;;  %v3518_v39 = vpop.f32.mrb[7].mxu0 }
 0x4be   : > { %v1102_v40 = vpop.f32.mrb[12].mxu1 }
 0x4bf   : > { %v1340_v41 = vmul.f32 0.35355338, %v1102_v40  ;;  %v3523_v42 = vpop.f32.mrb[13].mxu1  ;;  %v1180_v43 = vpop.f32.mrb[8].mxu0 }
 0x4c0   : > { %v1341_v44 = vmul.f32 0.35355338, %v1180_v43  ;;  %v3528_v45 = vpop.f32.mrb[9].mxu0 }
 0x4c1   : > { %v1344_v46 = vsel %vm366_vm2, %v1340_v41, -inf }
 0x4c2   : > { %1345 = vmax.xlane.f32.xlu0 %v1344_v46  ;;  %v1258_v47 = vpop.f32.mrb[14].mxu1  ;;  %v1347_v48 = vsel %vm366_vm2, %v1341_v44, -inf }
 0x4c3   : > { %v1342_v49 = vmul.f32 0.35355338, %v1258_v47  ;;  %v3533_v50 = vpop.f32.mrb[15].mxu1  ;;  %1348 = vmax.xlane.f32.xlu1 %v1347_v48  ;;  %v1336_v51 = vpop.f32.mrb[10].mxu0 }
 0x4c4   : > { %v3538_v52 = vpop.f32.mrb[11].mxu0  ;;  %v1343_v53 = vmul.f32 0.35355338, %v1336_v51 }
 0x4c5   : > { %v1350_v54 = vsel %vm366_vm2, %v1342_v49, -inf }
 0x4c6   : > { %1351 = vmax.xlane.f32.xlu0 %v1350_v54  ;;  %v1353_v55 = vsel %vm366_vm2, %v1343_v53, -inf }
 0x4ca   : > { %1354 = vmax.xlane.f32.xlu0 %v1353_v55 }
 0x4d4   : > { %1388 = vrot.lane.b32.xlu1 %v4186_v24, %s3964_s11 }
 0x4d8   : > { %1540 = vrot.lane.b32.xlu1 %v4191_v26, %s3964_s11 }
 0x4dc   : > { %1616 = vrot.lane.b32.xlu1 %v4189_v25, %s3964_s11 }
 0x4e0   : > { %1464 = vrot.lane.b32.xlu0 %v4184_v23, %s3964_s11  ;;  %1793 = vrot.lane.b32.xlu1 %v4184_v23, %s3965_s26 }
 0x4e4   : > { %1715 = vrot.lane.b32.xlu0 %v4186_v24, %s3965_s26 }
 0x54f   : > { %v1346_v56 = vpop.xlane.xlu0 %1345 }
 0x550   : > { %v1356_v57 = vsub.f32 %v1340_v41, %v1346_v56  ;;  %v1349_v58 = vpop.xlane.xlu1 %1348 }
 0x551   : > { %v1357_v59 = vsub.f32 %v1341_v44, %v1349_v58 }
 0x552   : > { %v1360_v60 = vmul.f32 1.442695, %v1356_v57 }
 0x553   : > { %v1362_v61 = vmul.f32 1.442695, %v1357_v59  ;;  %v1352_v62 = vpop.xlane.xlu0 %1351 }
 0x554   : > { %3779 = vpow2.f32 %v1360_v60  ;;  %v1389_v63 = vpop.permute.xlu1 %1388  ;;  %v1358_v10 = vsub.f32 %v1342_v49, %v1352_v62 }
 0x555   : > { %3781 = vpow2.f32 %v1362_v61  ;;  %3540 = vmatpush3.msra.mxu1 %v1389_v63 }
 0x556   : > { %3549 = vmatprep.subr.mxu1 %v3958_v22  ;;  %v1364_v11 = vmul.f32 1.442695, %v1358_v10 }
 0x557   : > { %v1355_v0 = vpop.xlane.xlu0 %1354 }
 0x558   : > { %v1359_v1 = vsub.f32 %v1343_v53, %v1355_v0  ;;  %v1541_v14 = vpop.permute.xlu1 %1540 }
 0x55a   : > { %v1366_v2 = vmul.f32 1.442695, %v1359_v1 }
 0x55b   : > { %v1465_v3 = vpop.permute.xlu0 %1464 }
 0x55c   : > { %3783 = vpow2.f32 %v1366_v2  ;;  %3545 = vmatpush3.msra.mxu0 %v1465_v3  ;;  %v1617_v15 = vpop.permute.xlu1 %1616 }
 0x55d   : > { %3554 = vmatprep.subr.mxu0 %v3958_v22  ;;  %3785 = vpow2.f32 %v1364_v11 }
 0x55e   : > { %v3780_v4 = vpop.eup %3779 }
 0x55f   : > { %v3782_v5 = vpop.eup %3781  ;;  %v1368_v6 = vsel %vm366_vm2, %v3780_v4, 0.0  ;;  %v1716_v17 = vpop.permute.xlu0 %1715 }
 0x560   : > { %1369 = vadd.xlane.f32.xlu1 %v1368_v6  ;;  %v1371_v7 = vsel %vm366_vm2, %v3782_v5, 0.0  ;;  %v1794_v16 = vpop.permute.xlu1 %1793 }
 0x561   : > { %1372 = vadd.xlane.f32.xlu0 %v1371_v7 }
 0x566   : > { %v3784_v8 = vpop.eup %3783 }
 0x567   : > { %v1377_v9 = vsel %vm366_vm2, %v3784_v8, 0.0  ;;  %v3786_v12 = vpop.eup %3785 }
 0x568   : > { %1378 = vadd.xlane.f32.xlu0 %v1377_v9  ;;  %v1374_v13 = vsel %vm366_vm2, %v3786_v12, 0.0 }
 0x571   : > { %1791 = vrot.lane.b32.xlu1 %v4184_v23, %s3966_s28 }
 0x57e   : > { %1713 = vrot.lane.b32.xlu0 %v4186_v24, %s3966_s28 }
 0x582   : > { %1871 = vrot.lane.b32.xlu0 %v4191_v26, %s3965_s26 }
 0x586   : > { %1869 = vrot.lane.b32.xlu0 %v4191_v26, %s3966_s28 }
 0x58a   : > { %2149 = vrot.lane.b32.xlu0 %v4184_v23, %s3967_s29 }
 0x595   : > { %1375 = vadd.xlane.f32.xlu1 %v1374_v13 }
 0x5a6   : > { %1949 = vrot.lane.b32.xlu1 %v4189_v25, %s3965_s26 }
 0x5aa   : > { %1947 = vrot.lane.b32.xlu1 %v4189_v25, %s3966_s28 }
 0x5ae   : > { %2073 = vrot.lane.b32.xlu1 %v4186_v24, %s3967_s29 }
 0x5b2   : > { %2225 = vrot.lane.b32.xlu1 %v4191_v26, %s3967_s29 }
 0x5b6   : > { %2301 = vrot.lane.b32.xlu1 %v4189_v25, %s3967_s29 }
 0x5ed   : > { %v1370_v18 = vpop.xlane.xlu1 %1369 }
 0x5ee   : > { %3787 = vrcp.f32 %v1370_v18  ;;  %v1373_v19 = vpop.xlane.xlu0 %1372 }
 0x5ef   : > { %3789 = vrcp.f32 %v1373_v19 }
 0x5f1   : > { %v1792_v32 = vpop.permute.xlu1 %1791 }
 0x5f5   : > { %v1379_v20 = vpop.xlane.xlu0 %1378 }
 0x5f6   : > { %3791 = vrcp.f32 %v1379_v20 }
 0x5f8   : > { %v3788_v21 = vpop.eup %3787 }
 0x5f9   : > { %v3790_v27 = vpop.eup %3789  ;;  %v1381_v28 = vmul.f32 %v3788_v21, %v3780_v4  ;;  %v1714_v33 = vpop.permute.xlu0 %1713 }
 0x5fa   : > { %v1383_v29 = vmul.f32 %v3790_v27, %v3782_v5 }
 0x5fb   : > { %3542 = vmatmul.mubr.msk.f32.vlgmr.msra.gmra.mrb[16].mxu1 %vm366_vm2, %v1381_v28 }
 0x5fc   : > { %3550 = vmatpush3.msra.mxu1 %v1541_v14  ;;  %3547 = vmatmul.mubr.msk.f32.vlgmr.msra.gmra.mrb[12].mxu0 %vm366_vm2, %v1383_v29 }
 0x5fd   : > { %3555 = vmatpush3.msra.mxu0 %v1617_v15  ;;  %3556 = vmatprep.mubr.msk.f32.mxu0 %vm3959_vm1, %v3958_v22  ;;  %v1872_v34 = vpop.permute.xlu0 %1871 }
 0x5fe   : > { %3564 = vmatprep.subr.mxu0 %v3958_v22  ;;  %3551 = vmatprep.mubr.msk.f32.mxu1 %vm3959_vm1, %v3958_v22 }
 0x5ff   : > { %3559 = vmatprep.subr.mxu1 %v3958_v22 }
 0x600   : > { %v3792_v30 = vpop.eup %3791 }
 0x601   : > { %v1387_v31 = vmul.f32 %v3792_v30, %v3784_v8  ;;  %v1870_v36 = vpop.permute.xlu0 %1869 }
 0x603   : > { %3557 = vmatmul.mubr.msk.f32.vlgmr.msra.gmra.mrb[14].mxu0 %vm366_vm2, %v1387_v31 }
 0x604   : > { %3565 = vmatpush3.xpose.msk.msra.mxu0 %vm366_vm2, %v1794_v16  ;;  %3566 = vmatprep.mubr.msk.f32.mxu0 %vm3959_vm1, %v3958_v22 }
 0x605   : > { %3574 = vmatprep.subr.mxu0 %v3958_v22  ;;  %v2150_v39 = vpop.permute.xlu0 %2149 }
 0x607   : > { %3567 = vmatmul.mubr.msk.f32.vlgmr.msra.gmra.mrb[16].mxu0 %vm366_vm2, %v1792_v32 }
 0x608   : > { %3576 = vmatprep.mubr.msk.f32.mxu0 %vm3959_vm1, %v3958_v22 }
 0x622   : > { %v1376_v35 = vpop.xlane.xlu1 %1375 }
 0x623   : > { %3793 = vrcp.f32 %v1376_v35 }
 0x626   : > { %v1950_v37 = vpop.permute.xlu1 %1949 }
 0x627   : > { %3575 = vmatpush3.xpose.msk.msra.mxu0 %vm366_vm2, %v1950_v37 }
 0x628   : > { %3584 = vmatprep.subr.mxu0 %v3958_v22 }
 0x62a   : > { %v1948_v38 = vpop.permute.xlu1 %1947 }
 0x62b   : > { %3577 = vmatmul.mubr.msk.f32.vlgmr.msra.gmra.mrb[18].mxu0 %vm366_vm2, %v1948_v38 }
 0x62c   : > { %3585 = vmatpush3.msra.mxu0 %v2150_v39  ;;  %3586 = vmatprep.mubr.msk.f32.mxu0 %vm3959_vm1, %v3958_v22 }
 0x62d   : > { %v3794_v40 = vpop.eup %3793  ;;  %3594 = vmatprep.subr.mxu0 %v3958_v22 }
 0x62e   : > { %v1385_v41 = vmul.f32 %v3794_v40, %v3786_v12  ;;  %v2074_v42 = vpop.permute.xlu1 %2073 }
 0x630   : > { %3552 = vmatmul.mubr.msk.f32.vlgmr.msra.gmra.mrb[18].mxu1 %vm366_vm2, %v1385_v41 }
 0x631   : > { %3560 = vmatpush3.xpose.msk.msra.mxu1 %vm366_vm2, %v1716_v17  ;;  %3561 = vmatprep.mubr.msk.f32.mxu1 %vm3959_vm1, %v3958_v22 }
 0x632   : > { %3569 = vmatprep.subr.mxu1 %v3958_v22  ;;  %v2226_v3 = vpop.permute.xlu1 %2225 }
 0x634   : > { %3562 = vmatmul.mubr.msk.f32.vlgmr.msra.gmra.mrb[20].mxu1 %vm366_vm2, %v1714_v33 }
 0x635   : > { %3570 = vmatpush3.xpose.msk.msra.mxu1 %vm366_vm2, %v1872_v34  ;;  %3571 = vmatprep.mubr.msk.f32.mxu1 %vm3959_vm1, %v3958_v22 }
 0x636   : > { %3579 = vmatprep.subr.mxu1 %v3958_v22  ;;  %v2302_v4 = vpop.permute.xlu1 %2301 }
 0x638   : > { %3572 = vmatmul.mubr.msk.f32.vlgmr.msra.gmra.mrb[22].mxu1 %vm366_vm2, %v1870_v36 }
 0x639   : > { %3580 = vmatpush3.msra.mxu1 %v2074_v42  ;;  %3581 = vmatprep.mubr.msk.f32.mxu1 %vm3959_vm1, %v3958_v22 }
 0x63a   : > { %3589 = vmatprep.subr.mxu1 %v3958_v22 }
 0x6ce   : > { %v4350_v43 = vpop.f32.mrb[16].mxu1 }
 0x6cf   : > { %v3543_v44 = vpop.f32.mrb[17].mxu1  ;;  %v4352_v45 = vpop.f32.mrb[12].mxu0 }
 0x6d0   : > { %v3548_v46 = vpop.f32.mrb[13].mxu0 }
 0x6d6   : > { %v4354_v47 = vpop.f32.mrb[14].mxu0 }
 0x6d7   : > { %v3558_v48 = vpop.f32.mrb[15].mxu0 }
 0x6da   : > { %v1865_v49 = vpop.f32.mrb[16].mxu0 }
 0x6db   : > { %v2026_v50 = vmul.f32 0.35355338, %v1865_v49  ;;  %v3568_v51 = vpop.f32.mrb[17].mxu0 }
 0x6dd   : > { %v2032_v52 = vsel %vm366_vm2, %v2026_v50, -inf }
 0x6de   : > { %2033 = vmax.xlane.f32.xlu1 %v2032_v52 }
 0x6ef   : > { %2478 = vrot.lane.b32.xlu1 %v4184_v23, %s3968_s30 }
 0x6f3   : > { %2476 = vrot.lane.b32.xlu1 %v4184_v23, %s3969_s25 }
 0x6fe   : > { %v2021_v53 = vpop.f32.mrb[18].mxu0 }
 0x6ff   : > { %v3578_v54 = vpop.f32.mrb[19].mxu0  ;;  %v2028_v60 = vmul.f32 0.35355338, %v2021_v53 }
 0x701   : > { %v2038_v1 = vsel %vm366_vm2, %v2028_v60, -inf }
 0x703   : > { %v4361_v55 = vpop.f32.mrb[18].mxu1 }
 0x704   : > { %v3553_v56 = vpop.f32.mrb[19].mxu1 }
 0x707   : > { %v1787_v57 = vpop.f32.mrb[20].mxu1 }
 0x708   : > { %v2025_v58 = vmul.f32 0.35355338, %v1787_v57  ;;  %v3563_v59 = vpop.f32.mrb[21].mxu1 }
 0x70a   : > { %v2029_v61 = vsel %vm366_vm2, %v2025_v58, -inf }
 0x70b   : > { %2030 = vmax.xlane.f32.xlu0 %v2029_v61  ;;  %v1943_v62 = vpop.f32.mrb[22].mxu1 }
 0x70c   : > { %v3573_v63 = vpop.f32.mrb[23].mxu1  ;;  %v2027_v0 = vmul.f32 0.35355338, %v1943_v62 }
 0x70e   : > { %v2035_v2 = vsel %vm366_vm2, %v2027_v0, -inf }
 0x70f   : > { %2039 = vmax.xlane.f32.xlu0 %v2038_v1 }
 0x713   : > { %2036 = vmax.xlane.f32.xlu0 %v2035_v2 }
 0x729   : > { %2400 = vrot.lane.b32.xlu0 %v4186_v24, %s3968_s30 }
 0x76b   : > { %v2034_v5 = vpop.xlane.xlu1 %2033 }
 0x76c   : > { %v2042_v6 = vsub.f32 %v2026_v50, %v2034_v5 }
 0x76e   : > { %v2047_v7 = vmul.f32 1.442695, %v2042_v6 }
 0x76f   : > { %v2479_v34 = vpop.permute.xlu1 %2478 }
 0x770   : > { %3795 = vpow2.f32 %v2047_v7 }
 0x773   : > { %v2477_v35 = vpop.permute.xlu1 %2476 }
 0x77a   : > { %v3796_v8 = vpop.eup %3795 }
 0x77b   : > { %v2056_v9 = vsel %vm366_vm2, %v3796_v8, 0.0 }
 0x77c   : > { %2057 = vadd.xlane.f32.xlu0 %v2056_v9 }
 0x792   : > { %2398 = vrot.lane.b32.xlu0 %v4186_v24, %s3969_s25 }
 0x798   : > { %v2031_v10 = vpop.xlane.xlu0 %2030 }
 0x799   : > { %v2041_v11 = vsub.f32 %v2025_v58, %v2031_v10 }
 0x79b   : > { %v2045_v12 = vmul.f32 1.442695, %v2041_v11 }
 0x79c   : > { %v2040_v13 = vpop.xlane.xlu0 %2039 }
 0x79d   : > { %3797 = vpow2.f32 %v2045_v12  ;;  %v2044_v14 = vsub.f32 %v2028_v60, %v2040_v13 }
 0x79f   : > { %v2051_v15 = vmul.f32 1.442695, %v2044_v14 }
 0x7a0   : > { %v2037_v20 = vpop.xlane.xlu0 %2036 }
 0x7a1   : > { %3799 = vpow2.f32 %v2051_v15  ;;  %v2043_v21 = vsub.f32 %v2027_v0, %v2037_v20 }
 0x7a3   : > { %v2049_v27 = vmul.f32 1.442695, %v2043_v21 }
 0x7a4   : > { %v2401_v30 = vpop.permute.xlu0 %2400 }
 0x7a5   : > { %3801 = vpow2.f32 %v2049_v27 }
 0x7a7   : > { %v3798_v16 = vpop.eup %3797 }
 0x7a8   : > { %v2053_v17 = vsel %vm366_vm2, %v3798_v16, 0.0 }
 0x7a9   : > { %2054 = vadd.xlane.f32.xlu1 %v2053_v17 }
 0x7ab   : > { %v3800_v18 = vpop.eup %3799 }
 0x7ac   : > { %v2062_v19 = vsel %vm366_vm2, %v3800_v18, 0.0 }
 0x7af   : > { %v3802_v28 = vpop.eup %3801 }
 0x7b0   : > { %v2059_v29 = vsel %vm366_vm2, %v3802_v28, 0.0 }
 0x7b1   : > { %2063 = vadd.xlane.f32.xlu0 %v2062_v19 }
 0x7ba   : > { %2634 = vrot.lane.b32.xlu1 %v4189_v25, %s3968_s30 }
 0x7c7   : > { %2556 = vrot.lane.b32.xlu0 %v4191_v26, %s3968_s30 }
 0x7cb   : > { %2554 = vrot.lane.b32.xlu0 %v4191_v26, %s3969_s25 }
 0x7de   : > { %2060 = vadd.xlane.f32.xlu1 %v2059_v29 }
 0x7ef   : > { %2632 = vrot.lane.b32.xlu1 %v4189_v25, %s3969_s25 }
 0x809   : > { %v2058_v31 = vpop.xlane.xlu0 %2057 }
 0x80a   : > { %3803 = vrcp.f32 %v2058_v31 }
 0x80d   : > { %v2399_v37 = vpop.permute.xlu0 %2398 }
 0x814   : > { %v3804_v32 = vpop.eup %3803 }
 0x815   : > { %v2068_v33 = vmul.f32 %v3804_v32, %v3796_v8 }
 0x817   : > { %3587 = vmatmul.mubr.msk.f32.vlgmr.msra.gmra.mrb[20].mxu0 %vm366_vm2, %v2068_v33 }
 0x818   : > { %3595 = vmatpush3.msra.mxu0 %v2302_v4  ;;  %3596 = vmatprep.mubr.msk.f32.mxu0 %vm3959_vm1, %v3958_v22 }
 0x819   : > { %3604 = vmatprep.subr.mxu0 %v3958_v22 }
 0x836   : > { %v2055_v36 = vpop.xlane.xlu1 %2054 }
 0x837   : > { %3805 = vrcp.f32 %v2055_v36 }
 0x83a   : > { %v2635_v44 = vpop.permute.xlu1 %2634 }
 0x83e   : > { %v2064_v38 = vpop.xlane.xlu0 %2063 }
 0x83f   : > { %3807 = vrcp.f32 %v2064_v38 }
 0x841   : > { %v3806_v39 = vpop.eup %3805 }
 0x842   : > { %v2066_v40 = vmul.f32 %v3806_v39, %v3798_v16  ;;  %v2557_v51 = vpop.permute.xlu0 %2556 }
 0x844   : > { %3582 = vmatmul.mubr.msk.f32.vlgmr.msra.gmra.mrb[24].mxu1 %vm366_vm2, %v2066_v40 }
 0x845   : > { %3590 = vmatpush3.msra.mxu1 %v2226_v3  ;;  %3591 = vmatprep.mubr.msk.f32.mxu1 %vm3959_vm1, %v3958_v22 }
 0x846   : > { %3599 = vmatprep.subr.mxu1 %v3958_v22  ;;  %v2555_v52 = vpop.permute.xlu0 %2554 }
 0x849   : > { %v3808_v41 = vpop.eup %3807 }
 0x84a   : > { %v2072_v42 = vmul.f32 %v3808_v41, %v3800_v18 }
 0x84c   : > { %3597 = vmatmul.mubr.msk.f32.vlgmr.msra.gmra.mrb[22].mxu0 %vm366_vm2, %v2072_v42 }
 0x84d   : > { %3605 = vmatpush3.xpose.msk.msra.mxu0 %vm366_vm2, %v2479_v34  ;;  %3606 = vmatprep.mubr.msk.f32.mxu0 %vm3959_vm1, %v3958_v22 }
 0x84e   : > { %3614 = vmatprep.subr.mxu0 %v3958_v22 }
 0x850   : > { %3607 = vmatmul.mubr.msk.f32.vlgmr.msra.gmra.mrb[24].mxu0 %vm366_vm2, %v2477_v35 }
 0x851   : > { %3615 = vmatpush3.xpose.msk.msra.mxu0 %vm366_vm2, %v2635_v44  ;;  %3616 = vmatprep.mubr.msk.f32.mxu0 %vm3959_vm1, %v3958_v22 }
 0x852   : > { %3624 = vmatprep.subr.mxu0 %v3958_v22 }
 0x86b   : > { %v2061_v46 = vpop.xlane.xlu1 %2060 }
 0x86c   : > { %3809 = vrcp.f32 %v2061_v46 }
 0x86f   : > { %v2633_v48 = vpop.permute.xlu1 %2632 }
 0x870   : > { %3617 = vmatmul.mubr.msk.f32.vlgmr.msra.gmra.mrb[26].mxu0 %vm366_vm2, %v2633_v48 }
 0x871   : > { %3626 = vmatprep.mubr.msk.f32.mxu0 %vm3959_vm1, %v3958_v22 }
 0x876   : > { %v3810_v49 = vpop.eup %3809 }
 0x877   : > { %v2070_v50 = vmul.f32 %v3810_v49, %v3802_v28 }
 0x879   : > { %3592 = vmatmul.mubr.msk.f32.vlgmr.msra.gmra.mrb[26].mxu1 %vm366_vm2, %v2070_v50 }
 0x87a   : > { %3600 = vmatpush3.xpose.msk.msra.mxu1 %vm366_vm2, %v2401_v30  ;;  %3601 = vmatprep.mubr.msk.f32.mxu1 %vm3959_vm1, %v3958_v22 }
 0x87b   : > { %3609 = vmatprep.subr.mxu1 %v3958_v22 }
 0x87d   : > { %3602 = vmatmul.mubr.msk.f32.vlgmr.msra.gmra.mrb[28].mxu1 %vm366_vm2, %v2399_v37 }
 0x87e   : > { %3610 = vmatpush3.xpose.msk.msra.mxu1 %vm366_vm2, %v2557_v51  ;;  %3611 = vmatprep.mubr.msk.f32.mxu1 %vm3959_vm1, %v3958_v22 }
 0x87f   : > { %3619 = vmatprep.subr.mxu1 %v3958_v22 }
 0x881   : > { %3612 = vmatmul.mubr.msk.f32.vlgmr.msra.gmra.mrb[30].mxu1 %vm366_vm2, %v2555_v52 }
 0x882   : > { %3621 = vmatprep.mubr.msk.f32.mxu1 %vm3959_vm1, %v3958_v22 }
 0x8ea   : > { %v4416_v53 = vpop.f32.mrb[20].mxu0 }
 0x8eb   : > { %v3588_v54 = vpop.f32.mrb[21].mxu0 }
 0x917   : > { %v2145_v56 = vpop.f32.mrb[24].mxu1 }
 0x918   : > { %v3583_v57 = vpop.f32.mrb[25].mxu1 }
 0x91f   : > { %v4418_v58 = vpop.f32.mrb[22].mxu0 }
 0x920   : > { %v3598_v59 = vpop.f32.mrb[23].mxu0 }
 0x921   : > { %v3088_v59 = vld [vmem:[#allocation7 + $0x8] sm:$0xff] }
 0x923   : > { %v2550_v60 = vpop.f32.mrb[24].mxu0 }
 0x924   : > { %v2711_v61 = vmul.f32 0.35355338, %v2550_v60  ;;  %v3608_v62 = vpop.f32.mrb[25].mxu0 }
 0x925   : > { %v3090_v62 = vld [vmem:[#allocation7 + $0x18] sm:$0xff] }
 0x926   : > { %v2717_v63 = vsel %vm366_vm2, %v2711_v61, -inf }
 0x927   : > { %2718 = vmax.xlane.f32.xlu1 %v2717_v63 }
 0x938   : > { %2758 = vrot.lane.b32.xlu1 %v4186_v24, %s3970_s8 }
 0x943   : > { %v2706_v0 = vpop.f32.mrb[26].mxu0 }
 0x944   : > { %v3618_v1 = vpop.f32.mrb[27].mxu0  ;;  %v2713_v11 = vmul.f32 0.35355338, %v2706_v0 }
 0x946   : > { %v2723_v13 = vsel %vm366_vm2, %v2713_v11, -inf }
 0x94c   : > { %v2297_v2 = vpop.f32.mrb[26].mxu1 }
 0x94d   : > { %v3593_v3 = vpop.f32.mrb[27].mxu1 }
 0x950   : > { %v2472_v4 = vpop.f32.mrb[28].mxu1 }
 0x951   : > { %v2710_v5 = vmul.f32 0.35355338, %v2472_v4  ;;  %v3603_v6 = vpop.f32.mrb[29].mxu1 }
 0x953   : > { %v2714_v7 = vsel %vm366_vm2, %v2710_v5, -inf }
 0x954   : > { %2715 = vmax.xlane.f32.xlu0 %v2714_v7  ;;  %v2628_v8 = vpop.f32.mrb[30].mxu1 }
 0x955   : > { %v2712_v9 = vmul.f32 0.35355338, %v2628_v8  ;;  %v3613_v10 = vpop.f32.mrb[31].mxu1 }
 0x957   : > { %v2720_v12 = vsel %vm366_vm2, %v2712_v9, -inf }
 0x958   : > { %2721 = vmax.xlane.f32.xlu0 %v2720_v12 }
 0x95c   : > { %2724 = vmax.xlane.f32.xlu0 %v2723_v13 }
 0x9b4   : > { %v2719_v24 = vpop.xlane.xlu1 %2718 }
 0x9b5   : > { %v2727_v14 = vsub.f32 %v2711_v61, %v2719_v24  ;;  %v3089_v61 = vld [vmem:[#allocation7 + $0x10] sm:$0xff] }
 0x9b6   : > { %v3681_v63 = vpack.c.bf16 %v3090_v62, %v3089_v61 }
 0x9b7   : > { %v2732_v15 = vmul.f32 1.442695, %v2727_v14 }
 0x9b8   : > { %v2759_v16 = vpop.permute.xlu1 %2758 }
 0x9b9   : > { %3811 = vpow2.f32 %v2732_v15  ;;  %3620 = vmatpush3.msra.mxu1 %v2759_v16  ;;  %v3353_v15 = vld [vmem:[%s4492_s3] ss:$0 sm:$0xff] }
 0x9ba   : > { %3629 = vmatprep.subr.mxu1 %v3958_v22 }
 0x9c3   : > { %v3812_v17 = vpop.eup %3811 }
 0x9c4   : > { %v2741_v18 = vsel %vm366_vm2, %v3812_v17, 0.0 }
 0x9c5   : > { %2742 = vadd.xlane.f32.xlu0 %v2741_v18 }
 0x9e1   : > { %v2716_v19 = vpop.xlane.xlu0 %2715 }
 0x9e2   : > { %v2726_v20 = vsub.f32 %v2710_v5, %v2716_v19 }
 0x9e4   : > { %v2730_v21 = vmul.f32 1.442695, %v2726_v20 }
 0x9e5   : > { %v2722_v27 = vpop.xlane.xlu0 %2721 }
 0x9e6   : > { %3813 = vpow2.f32 %v2730_v21  ;;  %v2728_v35 = vsub.f32 %v2712_v9, %v2722_v27 }
 0x9e8   : > { %v2734_v36 = vmul.f32 1.442695, %v2728_v35 }
 0x9e9   : > { %v2725_v28 = vpop.xlane.xlu0 %2724 }
 0x9ea   : > { %v2729_v29 = vsub.f32 %v2713_v11, %v2725_v28 }
 0x9ec   : > { %v2736_v30 = vmul.f32 1.442695, %v2729_v29 }
 0x9ee   : > { %3815 = vpow2.f32 %v2736_v30 }
 0x9ef   : > { %3817 = vpow2.f32 %v2734_v36 }
 0x9f0   : > { %v3814_v31 = vpop.eup %3813 }
 0x9f1   : > { %v2738_v32 = vsel %vm366_vm2, %v3814_v31, 0.0 }
 0x9f2   : > { %2739 = vadd.xlane.f32.xlu1 %v2738_v32 }
 0x9f8   : > { %v3816_v33 = vpop.eup %3815 }
 0x9f9   : > { %v2747_v34 = vsel %vm366_vm2, %v3816_v33, 0.0  ;;  %v3818_v37 = vpop.eup %3817 }
 0x9fa   : > { %2748 = vadd.xlane.f32.xlu0 %v2747_v34  ;;  %v2744_v38 = vsel %vm366_vm2, %v3818_v37, 0.0 }
 0xa03   : > { %2910 = vrot.lane.b32.xlu1 %v4191_v26, %s3970_s8 }
 0xa10   : > { %2834 = vrot.lane.b32.xlu0 %v4184_v23, %s3970_s8 }
 0xa14   : > { %1696 = vrot.lane.b32.xlu0 %v4350_v43, %s3971_s13 }
 0xa18   : > { %2381 = vrot.lane.b32.xlu0 %v2145_v56, %s3972_s9 }
 0xa1c   : > { %1700 = vrot.lane.b32.xlu0 %v4361_v55, %s3971_s13 }
 0xa20   : > { %2385 = vrot.lane.b32.xlu0 %v2297_v2, %s3972_s9 }
 0xa27   : > { %2745 = vadd.xlane.f32.xlu1 %v2744_v38 }
 0xa38   : > { %2986 = vrot.lane.b32.xlu1 %v4189_v25, %s3970_s8 }
 0xa3c   : > { %1698 = vrot.lane.b32.xlu1 %v4352_v45, %s3971_s13 }
 0xa40   : > { %2383 = vrot.lane.b32.xlu1 %v4416_v53, %s3972_s9 }
 0xa44   : > { %1702 = vrot.lane.b32.xlu1 %v4354_v47, %s3971_s13 }
 0xa48   : > { %2387 = vrot.lane.b32.xlu1 %v4418_v58, %s3972_s9  ;;  %v3087_v58 = vld [vmem:[#allocation7] sm:$0xff] }
 0xa49   : > { %v3677_v60 = vpack.c.bf16 %v3088_v59, %v3087_v58 }
 0xa52   : > { %v2743_v23 = vpop.xlane.xlu0 %2742 }
 0xa53   : > { %3819 = vrcp.f32 %v2743_v23 }
 0xa5d   : > { %v3820_v55 = vpop.eup %3819 }
 0xa5e   : > { %v2753_v40 = vmul.f32 %v3820_v55, %v3812_v17 }
 0xa7f   : > { %v2740_v26 = vpop.xlane.xlu1 %2739 }
 0xa80   : > { %3821 = vrcp.f32 %v2740_v26 }
 0xa83   : > { %v2911_v25 = vpop.permute.xlu1 %2910 }
 0xa87   : > { %v2749_v43 = vpop.xlane.xlu0 %2748 }
 0xa88   : > { %3823 = vrcp.f32 %v2749_v43 }
 0xa8a   : > { %v3822_v39 = vpop.eup %3821 }
 0xa8b   : > { %v2751_v41 = vmul.f32 %v3822_v39, %v3814_v31  ;;  %v2835_v42 = vpop.permute.xlu0 %2834 }
 0xa8c   : > { %3625 = vmatpush3.msra.mxu0 %v2835_v42 }
 0xa8d   : > { %3622 = vmatmul.mubr.msk.f32.vlgmr.msra.gmra.mrb[32].mxu1 %vm366_vm2, %v2751_v41  ;;  %3627 = vmatmul.mubr.msk.f32.vlgmr.msra.gmra.mrb[28].mxu0 %vm366_vm2, %v2753_v40 }
 0xa8e   : > { %3630 = vmatpush3.msra.mxu1 %v2911_v25  ;;  %3634 = vmatprep.subr.mxu0 %v3958_v22 }
 0xa8f   : > { %v1697_v45 = vpop.permute.xlu0 %1696  ;;  %3636 = vmatprep.mubr.msk.f32.mxu0 %vm3959_vm1, %v3958_v22  ;;  %3631 = vmatprep.mubr.msk.f32.mxu1 %vm3959_vm1, %v3958_v22 }
 0xa90   : > { %1709 = vst.msk [vmem:[#allocation2] sm:$0xff] %vm1708_vm3, %v1697_v45  ;;  %3678 = vmatprep.subr.bf16.mxu1 %v3677_v60 }
 0xa92   : > { %v3824_v49 = vpop.eup %3823 }
 0xa93   : > { %v2382_v47 = vpop.permute.xlu0 %2381  ;;  %v2757_v50 = vmul.f32 %v3824_v49, %v3816_v33 }
 0xa94   : > { %2394 = vst.msk [vmem:[#allocation2] sm:$0xff] %vm2393_vm4, %v2382_v47 }
 0xa97   : > { %v1701_v44 = vpop.permute.xlu0 %1700 }
 0xa98   : > { %1711 = vst.msk [vmem:[#allocation2 + $0x10] sm:$0xff] %vm1708_vm3, %v1701_v44 }
 0xa9b   : > { %v2386_v46 = vpop.permute.xlu0 %2385 }
 0xa9c   : > { %2396 = vst.msk [vmem:[#allocation2 + $0x10] sm:$0xff] %vm2393_vm4, %v2386_v46 }
 0xab4   : > { %v2746_v48 = vpop.xlane.xlu1 %2745 }
 0xab5   : > { %3825 = vrcp.f32 %v2746_v48 }
 0xab8   : > { %v2987_v51 = vpop.permute.xlu1 %2986 }
 0xab9   : > { %3635 = vmatpush3.msra.mxu0 %v2987_v51 }
 0xaba   : > { %3637 = vmatmul.mubr.msk.f32.vlgmr.msra.gmra.mrb[30].mxu0 %vm366_vm2, %v2757_v50 }
 0xabc   : > { %v1699_v22 = vpop.permute.xlu1 %1698 }
 0xabd   : > { %1710 = vst.msk [vmem:[#allocation2 + $0x8] sm:$0xff] %vm1708_vm3, %v1699_v22 }
 0xabf   : > { %v3826_v52 = vpop.eup %3825 }
 0xac0   : > { %v2755_v53 = vmul.f32 %v3826_v52, %v3818_v37  ;;  %v2384_v54 = vpop.permute.xlu1 %2383 }
 0xac1   : > { %2395 = vst.msk [vmem:[#allocation2 + $0x8] sm:$0xff] %vm2393_vm4, %v2384_v54 }
 0xac2   : > { %3632 = vmatmul.mubr.msk.f32.vlgmr.msra.gmra.mrb[34].mxu1 %vm366_vm2, %v2755_v53 }
 0xac3   : > { %3680 = vmatpush3.bf16.msra.mxu1 %v3677_v60 }
 0xac4   : > { %v1703_v56 = vpop.permute.xlu1 %1702  ;;  %3682 = vmatprep.subr.bf16.mxu1 %v3681_v63 }
 0xac5   : > { %1712 = vst.msk [vmem:[#allocation2 + $0x18] sm:$0xff] %vm1708_vm3, %v1703_v56 }
 0xac7   : > { %3684 = vmatpush3.bf16.msra.mxu1 %v3681_v63 }
 0xac8   : > { %v2388_v57 = vpop.permute.xlu1 %2387 }
 0xac9   : > { %2397 = vst.msk [vmem:[#allocation2 + $0x18] sm:$0xff] %vm2393_vm4, %v2388_v57 }
 0xb60   : > { %v2830_v0 = vpop.f32.mrb[32].mxu1  ;;  %v2906_v1 = vpop.f32.mrb[28].mxu0 }
 0xb61   : > { %v3623_v2 = vpop.f32.mrb[33].mxu1  ;;  %3066 = vrot.lane.b32.xlu0 %v2830_v0, %s3973_s14  ;;  %3068 = vrot.lane.b32.xlu1 %v2906_v1, %s3973_s14  ;;  %v3628_v3 = vpop.f32.mrb[29].mxu0 }
 0xb8d   : > { %v3058_v4 = vpop.f32.mrb[30].mxu0 }
 0xb8e   : > { %3072 = vrot.lane.b32.xlu1 %v3058_v4, %s3973_s14  ;;  %v3638_v5 = vpop.f32.mrb[31].mxu0 }
 0xb95   : > { %v2982_v6 = vpop.f32.mrb[34].mxu1 }
 0xb96   : > { %v3633_v7 = vpop.f32.mrb[35].mxu1  ;;  %3070 = vrot.lane.b32.xlu0 %v2982_v6, %s3973_s14 }
 0xbd3   : > { %v3067_v8 = vpop.permute.xlu0 %3066  ;;  %v3069_v9 = vpop.permute.xlu1 %3068 }
 0xbd4   : > { %3079 = vst.msk [vmem:[#allocation2] sm:$0xff] %vm3078_vm5, %v3067_v8  ;;  %3080 = vst.msk [vmem:[#allocation2 + $0x8] sm:$0xff] %vm3078_vm5, %v3069_v9 }
 0xbdb   : > { %v3083_v10 = vld [vmem:[#allocation2] sm:$0xff]  ;;  %v3084_v11 = vld [vmem:[#allocation2 + $0x8] sm:$0xff] }
 0xbdc   : > { %3647 = vmatprep.mubr.msk.f32.mxu1 %vm3098_vm6, %v3083_v10 }
 0xbdd   : > { %3648 = vmatmul.mubr.msk.f32.vlgmr.msra.gmra.mrb[36].mxu1 %vm3098_vm6, %v3084_v11 }
 0xc00   : > { %v3073_v12 = vpop.permute.xlu1 %3072 }
 0xc01   : > { %3082 = vst.msk [vmem:[#allocation2 + $0x18] sm:$0xff] %vm3078_vm5, %v3073_v12 }
 0xc08   : > { %v3071_v13 = vpop.permute.xlu0 %3070  ;;  %v3086_v14 = vld [vmem:[#allocation2 + $0x18] sm:$0xff] }
 0xc09   : > { %3081 = vst.msk [vmem:[#allocation2 + $0x10] sm:$0xff] %vm3078_vm5, %v3071_v13 }
 0xc10   : > { %v3085_v24 = vld [vmem:[#allocation2 + $0x10] sm:$0xff] }
 0xc11   : > { %3650 = vmatprep.mubr.msk.f32.mxu1 %vm3098_vm6, %v3085_v24 }
 0xc12   : > { %3651 = vmatmul.mubr.msk.f32.gmra.mrb[38].mxu1 %vm3098_vm6, %v3086_v14 }
 0xcb0   : > { %v3649_v16 = vpop.f32.mrb[36].mxu1 }
 0xcb1   : > { %v3177_v17 = vpop.f32.mrb[37].mxu1  ;;  %v3183_v19 = vadd.f32 %v3649_v16, %v3353_v15 }
 0xcb2   : > { %v3178_v18 = vadd.f32 %v3353_v15, %v3177_v17 }
 0xcb3   : > { %3197 = vst.msk [vmem:[%s247_s20 + $0x8] sm:$0xff] %vm3098_vm6, %v3183_v19 }
 0xcb4   : > { %3196 = vst.msk [vmem:[%s247_s20] sm:$0xff] %vm3098_vm6, %v3178_v18 }
 0xce5   : > { %v3652_v20 = vpop.f32.mrb[38].mxu1 }
 0xce6   : > { %v3187_v21 = vpop.f32.mrb[39].mxu1  ;;  %v3193_v28 = vadd.f32 %v3652_v20, %v3353_v15 }
 0xce7   : > { %v3188_v27 = vadd.f32 %v3353_v15, %v3187_v21 }
 0xce8   : > { %3199 = vst.msk [vmem:[%s247_s20 + $0x18] sm:$0xff] %vm3098_vm6, %v3193_v28 }
 0xce9   : > { %3198 = vst.msk [vmem:[%s247_s20 + $0x10] sm:$0xff] %vm3098_vm6, %v3188_v27 }
 0xcea PF: > { %p15_p6 = scmp.ge.s32.totalorder %s4101_s7, 4   ;;  %s4506_s15 = smov %s3943_s16 }
 0xceb   : > { %s4507_s16 = smov %s3947_s17  ;;  %s4508_s17 = smov %s4112_s12 }
 0xcec   : > { %s4509_s18 = smov %s4101_s7  ;;  %17 = sbr.rel (!%p15_p6) target bundleno = 4 (0x4), region = 84 }
 0xcf3   :  { %3222 = vsyncpa [#allocation4], 1 }
 0xcf4   :  { %3224 = vsyncpa [#allocation4 + $0x1], 1 }
 0xcf5   :  { %3225 = vsyncpa [#allocation6], 1 }

</bundles_post_ra>
